<compile_context>
chip_gen: v5e
topology: v5e:2x2
jax: 0.10.0
libtpu: 0.0.40
codegen_flags: <defaults>
</compile_context>

<pallas_src>
import numpy as np
import jax
import jax.numpy as jnp
from jax.experimental import pallas as pl
from jax.experimental.pallas import tpu as pltpu

OUT = 224    # F.interpolate target size
CROP = 50    # zeroed low-frequency block


# ----------------------------------------------------------------------------
# Host-side (float64) operator construction
# ----------------------------------------------------------------------------
def _bilinear_matrix(in_size: int, out_size: int) -> np.ndarray:
    """Row-interpolation matrix matching PyTorch bilinear, align_corners=False."""
    scale = in_size / out_size
    i = np.arange(out_size, dtype=np.float64)
    src = scale * (i + 0.5) - 0.5
    src = np.maximum(src, 0.0)                    # PyTorch clamps negative src to 0
    i0 = np.floor(src).astype(np.int64)
    i0 = np.minimum(i0, in_size - 1)
    i1 = np.minimum(i0 + 1, in_size - 1)
    l1 = src - i0
    l0 = 1.0 - l1
    m = np.zeros((out_size, in_size), dtype=np.float64)
    idx = np.arange(out_size)
    m[idx, i0] += l0
    m[idx, i1] += l1
    return m


def _build_operators(h: int, w: int):
    """Precompute the three (L_k, R_k) pairs so that
       masked_energy(X) = sum_k sum(X * (L_k @ X @ R_k))  for X = x - y (H,W)."""
    A = _bilinear_matrix(h, OUT)             # (224, h): d = A @ X @ Bc^T
    Bc = _bilinear_matrix(w, OUT)            # (224, w)
    k = np.arange(OUT, dtype=np.float64)
    ang = -2.0 * np.pi * np.outer(k, k) / OUT
    Wr, Wi = np.cos(ang), np.sin(ang)        # symmetric DFT matrix W = Wr + i*Wi

    # Low-frequency block folded with the resize: F[:50,:50] = Prow @ X @ Pcol
    Pr_r, Pr_i = Wr[:CROP] @ A, Wi[:CROP] @ A                    # (50, h)
    Pc_r, Pc_i = Bc.T @ Wr[:, :CROP], Bc.T @ Wi[:, :CROP]        # (w, 50)

    GLr = Pr_r.T @ Pr_r + Pr_i.T @ Pr_i      # Re(Prow^H Prow)   (h, h)
    GLi = Pr_r.T @ Pr_i - Pr_i.T @ Pr_r      # Im(Prow^H Prow)
    GRr = Pc_r @ Pc_r.T + Pc_i @ Pc_i.T      # Re(Pcol Pcol^H)   (w, w)
    GRi = Pc_i @ Pc_r.T - Pc_r @ Pc_i.T      # Im(Pcol Pcol^H)

    GA = A.T @ A                             # resize Gram (rows)   (h, h)
    GB = Bc.T @ Bc                           # resize Gram (cols)   (w, w)

    # Parseval term (+224^2*GA, GB), minus the real/imag parts of the block.
    L = np.stack([float(OUT * OUT) * GA, -GLr, GLi]).astype(np.float32)  # (3,h,h)
    R = np.stack([GB, GRr, GRi]).astype(np.float32)                      # (3,w,w)
    return L, R


# ----------------------------------------------------------------------------
# Kernel
# ----------------------------------------------------------------------------
def _freq_loss_kernel(x_ref, y_ref, l_ref, r_ref, o_ref):
    # grid = (shards, steps_per_shard); axis 1 is the reduction axis, so each
    # shard's output block is a persistent accumulator.
    @pl.when(pl.program_id(1) == 0)
    def _():
        o_ref[...] = jnp.zeros_like(o_ref)

    diff = x_ref[...] - y_ref[...]                    # (B, H, W) f32
    b, h, w = diff.shape
    xf = diff.reshape(b * h, w)                       # flatten batch: pure 2-D matmuls

    step = jnp.float32(0.0)
    for k in range(3):                                # unrolled: 3 (L, R) operator pairs
        # Z_b = X_b @ R_k, done as one (B*H, W) @ (W, W) MXU matmul.
        z = jnp.dot(xf, r_ref[k],
                    preferred_element_type=jnp.float32,
                    precision=jax.lax.Precision.HIGHEST)
        z = z.reshape(b, h, w)
        # C_b = X_b @ Z_b^T  (contraction over W, shared batch dim).
        c = jnp.einsum('bij,bmj->bim', diff, z,
                       preferred_element_type=jnp.float32,
                       precision=jax.lax.Precision.HIGHEST)       # (B, H, H)
        # sum_b sum(L_k * C_b)
        step = step + jnp.sum(jnp.sum(c, axis=0) * l_ref[k])

    # Lane-dense (1, 8, 128) accumulator block; every element carries the
    # running per-shard sum (scalar broadcast add — no masked narrow store).
    o_ref[...] = o_ref[...] + step


# ----------------------------------------------------------------------------
# Wrapper
# ----------------------------------------------------------------------------
def context_frequency_loss(x, y, *, images_per_step=8):
    assert x.shape == y.shape and x.ndim == 4, "expected NCHW inputs"
    n, c, h, w = x.shape
    # The torch module replicates single-channel images to 3 channels; that
    # scales numerator and denominator by the same factor -> loss unchanged,
    # so the replication (and its 3x HBM/compute cost) is skipped.
    nc = n * c

    xf = x.reshape(nc, h, w).astype(jnp.float32)
    yf = y.reshape(nc, h, w).astype(jnp.float32)

    bsz = max(1, min(images_per_step, nc))            # images per grid step
    steps = -(-nc // bsz)
    num_shards = 2 if steps >= 2 else 1               # use both v7x TensorCores
    sps = -(-steps // num_shards)                     # steps per shard
    padded = num_shards * sps * bsz
    if padded != nc:                                  # zero padding => zero diff => 0 contribution
        pad = padded - nc
        xf = jnp.concatenate([xf, jnp.zeros((pad, h, w), jnp.float32)], axis=0)
        yf = jnp.concatenate([yf, jnp.zeros((pad, h, w), jnp.float32)], axis=0)

    L_np, R_np = _build_operators(h, w)
    L = jnp.asarray(L_np)                             # (3, h, h)
    R = jnp.asarray(R_np)                             # (3, w, w)

    out = pl.pallas_call(
        _freq_loss_kernel,
        out_shape=jax.ShapeDtypeStruct((num_shards, 8, 128), jnp.float32),
        grid_spec=pltpu.PrefetchScalarGridSpec(
            num_scalar_prefetch=0,
            grid=(num_shards, sps),
            in_specs=[
                pl.BlockSpec((bsz, h, w), lambda s, t: (s * sps + t, 0, 0)),
                pl.BlockSpec((bsz, h, w), lambda s, t: (s * sps + t, 0, 0)),
                pl.BlockSpec((3, h, h), lambda s, t: (0, 0, 0)),
                pl.BlockSpec((3, w, w), lambda s, t: (0, 0, 0)),
            ],
            out_specs=pl.BlockSpec((1, 8, 128), lambda s, t: (s, 0, 0)),
        ),
        compiler_params=pltpu.CompilerParams(
            dimension_semantics=("parallel", "arbitrary")),
    )(xf, yf, L, R)

    total = jnp.sum(out[:, 0, 0])                     # sum partial sums over shards
    # mse(real) + mse(imag) == masked |F(resize(diff))|^2 summed / (N*C*224*224)
    return total / (nc * OUT * OUT)


# ----------------------------------------------------------------------------
# Pure-numpy reference (resize -> fft2 -> crop -> mse), for a sanity check.
# ----------------------------------------------------------------------------
def _reference_loss_numpy(x, y):
    x = np.asarray(x, dtype=np.float64)
    y = np.asarray(y, dtype=np.float64)
    n, c, h, w = x.shape
    A = _bilinear_matrix(h, OUT)
    Bc = _bilinear_matrix(w, OUT)
    xi = np.einsum('oh,nchw,pw->ncop', A, x, Bc)
    yi = np.einsum('oh,nchw,pw->ncop', A, y, Bc)
    if c == 1:
        xi = np.concatenate([xi, xi, xi], axis=1)
        yi = np.concatenate([yi, yi, yi], axis=1)
    fx = np.fft.fft2(xi)
    fy = np.fft.fft2(yi)
    fx[:, :, :CROP, :CROP] = 0
    fy[:, :, :CROP, :CROP] = 0
    d = fx - fy
    return float(np.mean(d.real ** 2) + np.mean(d.imag ** 2))


if __name__ == "__main__":
    key = jax.random.PRNGKey(0)
    k1, k2 = jax.random.split(key)
    x = jax.random.normal(k1, (2, 3, 16, 16), dtype=jnp.float32)   # NCHW "input"
    y = jax.random.normal(k2, (2, 3, 16, 16), dtype=jnp.float32)   # NCHW "target"

    # images_per_step=4 -> 2 shards x 1 step, exercises padding + parallel axis.
    loss = context_frequency_loss(x, y, images_per_step=4)
    jax.block_until_ready(loss)

    ref = _reference_loss_numpy(x, y)
    rel = abs(float(loss) - ref) / max(abs(ref), 1e-12)
    assert rel < 2e-2, f"mismatch: kernel={float(loss)} ref={ref} rel={rel}"
    print("KERNEL_OK")
</pallas_src>

<mosaic_0001>
module attributes {stable_mosaic.version = 11 : i64} {
  func.func @_freq_loss_kernel(%arg0: i32, %arg1: i32, %arg2: memref<4x16x16xf32, #tpu.memory_space<vmem>>, %arg3: memref<4x16x16xf32, #tpu.memory_space<vmem>>, %arg4: memref<3x16x16xf32, #tpu.memory_space<vmem>>, %arg5: memref<3x16x16xf32, #tpu.memory_space<vmem>>, %arg6: memref<1x8x128xf32, #tpu.memory_space<vmem>>) attributes {dimension_semantics = [#tpu.dimension_semantics<parallel>, #tpu.dimension_semantics<arbitrary>], iteration_bounds = array<i64: 2, 1>, scalar_prefetch = 0 : i64, scratch_operands = 0 : i64, tpu.core_type = #tpu.core_type<tc>, window_params = [{transform_indices = @transform_0, window_bounds = array<i64: 4, 16, 16>}, {transform_indices = @transform_1, window_bounds = array<i64: 4, 16, 16>}, {pipeline_mode = #tpu.pipeline_mode<synchronous>, transform_indices = @transform_2, window_bounds = array<i64: 3, 16, 16>}, {pipeline_mode = #tpu.pipeline_mode<synchronous>, transform_indices = @transform_3, window_bounds = array<i64: 3, 16, 16>}, {transform_indices = @transform_4, window_bounds = array<i64: 1, 8, 128>}]} {
    %c0_i32 = arith.constant 0 : i32
    %0 = arith.cmpi eq, %arg1, %c0_i32 : i32
    %1 = arith.extui %0 : i1 to i32
    %c0_i32_0 = arith.constant 0 : i32
    %2 = arith.cmpi ne, %1, %c0_i32_0 : i32
    scf.if %2 {
      %cst_40 = arith.constant 0.000000e+00 : f32
      %53 = vector.broadcast %cst_40 : f32 to vector<1x8x128xf32>
      %c0_41 = arith.constant 0 : index
      %c0_42 = arith.constant 0 : index
      %c0_43 = arith.constant 0 : index
      %54 = vector.load %arg6[%c0_41, %c0_42, %c0_43] : memref<1x8x128xf32, #tpu.memory_space<vmem>>, vector<1x8x128xf32>
      tpu.vector_store %arg6[%c0_41, %c0_42, %c0_43], %53 {strides = array<i32>} : memref<1x8x128xf32, #tpu.memory_space<vmem>>, vector<1x8x128xf32>,
    } else {
    }
    %c0 = arith.constant 0 : index
    %c0_1 = arith.constant 0 : index
    %c0_2 = arith.constant 0 : index
    %3 = vector.load %arg2[%c0, %c0_1, %c0_2] : memref<4x16x16xf32, #tpu.memory_space<vmem>>, vector<4x16x16xf32>
    %c0_3 = arith.constant 0 : index
    %c0_4 = arith.constant 0 : index
    %c0_5 = arith.constant 0 : index
    %4 = vector.load %arg3[%c0_3, %c0_4, %c0_5] : memref<4x16x16xf32, #tpu.memory_space<vmem>>, vector<4x16x16xf32>
    %5 = arith.subf %3, %4 : vector<4x16x16xf32>
    %6 = vector.shape_cast %5 : vector<4x16x16xf32> to vector<64x16xf32>
    %c0_6 = arith.constant 0 : index
    %c0_7 = arith.constant 0 : index
    %c0_8 = arith.constant 0 : index
    %7 = vector.load %arg5[%c0_6, %c0_7, %c0_8] : memref<3x16x16xf32, #tpu.memory_space<vmem>>, vector<1x16x16xf32>
    %8 = vector.shape_cast %7 : vector<1x16x16xf32> to vector<16x16xf32>
    %cst = arith.constant dense<0.000000e+00> : vector<64x16xf32>
    %9 = tpu.matmul %6, %8, %cst {dimension_numbers = #tpu.dot_dimension_numbers<[1], [0], [0], [1], [0, 0, 1, 1], [], []>, precision = #tpu.contract_precision<fp32>} : vector<64x16xf32>, vector<16x16xf32>, vector<64x16xf32> -> vector<64x16xf32>
    %10 = vector.shape_cast %9 : vector<64x16xf32> to vector<4x16x16xf32>
    "tpu.trace_start"() <{level = 10 : i32, message = "bij,bmj->bim"}> : () -> ()
    %cst_9 = arith.constant dense<0.000000e+00> : vector<4x16x16xf32>
    %11 = tpu.matmul %5, %10, %cst_9 {dimension_numbers = #tpu.dot_dimension_numbers<[2], [2], [1], [1], [0, 0, 0, 1, 1, 1], [0], [0]>, precision = #tpu.contract_precision<fp32>} : vector<4x16x16xf32>, vector<4x16x16xf32>, vector<4x16x16xf32> -> vector<4x16x16xf32>
    "tpu.trace_stop"() : () -> ()
    %cst_10 = arith.constant dense<0.000000e+00> : vector<16x16xf32>
    %12 = vector.multi_reduction <add>, %11, %cst_10 [0] : vector<4x16x16xf32> to vector<16x16xf32>
    %c0_11 = arith.constant 0 : index
    %c0_12 = arith.constant 0 : index
    %c0_13 = arith.constant 0 : index
    %13 = vector.load %arg4[%c0_11, %c0_12, %c0_13] : memref<3x16x16xf32, #tpu.memory_space<vmem>>, vector<1x16x16xf32>
    %14 = vector.shape_cast %13 : vector<1x16x16xf32> to vector<16x16xf32>
    %15 = arith.mulf %12, %14 : vector<16x16xf32>
    %16 = vector.shape_cast %15 : vector<16x16xf32> to vector<1x16x16xf32>
    %cst_14 = arith.constant dense<0.000000e+00> : vector<1xf32>
    %17 = vector.multi_reduction <add>, %16, %cst_14 [1, 2] : vector<1x16x16xf32> to vector<1xf32>
    %18 = vector.shape_cast %17 : vector<1xf32> to vector<1x1x1xf32>
    %19 = vector.extract %18[0, 0, 0] : f32 from vector<1x1x1xf32>
    %cst_15 = arith.constant 0.000000e+00 : f32
    %20 = arith.addf %cst_15, %19 : f32
    %c1 = arith.constant 1 : index
    %c0_16 = arith.constant 0 : index
    %c0_17 = arith.constant 0 : index
    %21 = vector.load %arg5[%c1, %c0_16, %c0_17] : memref<3x16x16xf32, #tpu.memory_space<vmem>>, vector<1x16x16xf32>
    %22 = vector.shape_cast %21 : vector<1x16x16xf32> to vector<16x16xf32>
    %cst_18 = arith.constant dense<0.000000e+00> : vector<64x16xf32>
    %23 = tpu.matmul %6, %22, %cst_18 {dimension_numbers = #tpu.dot_dimension_numbers<[1], [0], [0], [1], [0, 0, 1, 1], [], []>, precision = #tpu.contract_precision<fp32>} : vector<64x16xf32>, vector<16x16xf32>, vector<64x16xf32> -> vector<64x16xf32>
    %24 = vector.shape_cast %23 : vector<64x16xf32> to vector<4x16x16xf32>
    "tpu.trace_start"() <{level = 10 : i32, message = "bij,bmj->bim"}> : () -> ()
    %cst_19 = arith.constant dense<0.000000e+00> : vector<4x16x16xf32>
    %25 = tpu.matmul %5, %24, %cst_19 {dimension_numbers = #tpu.dot_dimension_numbers<[2], [2], [1], [1], [0, 0, 0, 1, 1, 1], [0], [0]>, precision = #tpu.contract_precision<fp32>} : vector<4x16x16xf32>, vector<4x16x16xf32>, vector<4x16x16xf32> -> vector<4x16x16xf32>
    "tpu.trace_stop"() : () -> ()
    %cst_20 = arith.constant dense<0.000000e+00> : vector<16x16xf32>
    %26 = vector.multi_reduction <add>, %25, %cst_20 [0] : vector<4x16x16xf32> to vector<16x16xf32>
    %c1_21 = arith.constant 1 : index
    %c0_22 = arith.constant 0 : index
    %c0_23 = arith.constant 0 : index
    %27 = vector.load %arg4[%c1_21, %c0_22, %c0_23] : memref<3x16x16xf32, #tpu.memory_space<vmem>>, vector<1x16x16xf32>
    %28 = vector.shape_cast %27 : vector<1x16x16xf32> to vector<16x16xf32>
    %29 = arith.mulf %26, %28 : vector<16x16xf32>
    %30 = vector.shape_cast %29 : vector<16x16xf32> to vector<1x16x16xf32>
    %cst_24 = arith.constant dense<0.000000e+00> : vector<1xf32>
    %31 = vector.multi_reduction <add>, %30, %cst_24 [1, 2] : vector<1x16x16xf32> to vector<1xf32>
    %32 = vector.shape_cast %31 : vector<1xf32> to vector<1x1x1xf32>
    %33 = vector.extract %32[0, 0, 0] : f32 from vector<1x1x1xf32>
    %34 = arith.addf %20, %33 : f32
    %c2 = arith.constant 2 : index
    %c0_25 = arith.constant 0 : index
    %c0_26 = arith.constant 0 : index
    %35 = vector.load %arg5[%c2, %c0_25, %c0_26] : memref<3x16x16xf32, #tpu.memory_space<vmem>>, vector<1x16x16xf32>
    %36 = vector.shape_cast %35 : vector<1x16x16xf32> to vector<16x16xf32>
    %cst_27 = arith.constant dense<0.000000e+00> : vector<64x16xf32>
    %37 = tpu.matmul %6, %36, %cst_27 {dimension_numbers = #tpu.dot_dimension_numbers<[1], [0], [0], [1], [0, 0, 1, 1], [], []>, precision = #tpu.contract_precision<fp32>} : vector<64x16xf32>, vector<16x16xf32>, vector<64x16xf32> -> vector<64x16xf32>
    %38 = vector.shape_cast %37 : vector<64x16xf32> to vector<4x16x16xf32>
    "tpu.trace_start"() <{level = 10 : i32, message = "bij,bmj->bim"}> : () -> ()
    %cst_28 = arith.constant dense<0.000000e+00> : vector<4x16x16xf32>
    %39 = tpu.matmul %5, %38, %cst_28 {dimension_numbers = #tpu.dot_dimension_numbers<[2], [2], [1], [1], [0, 0, 0, 1, 1, 1], [0], [0]>, precision = #tpu.contract_precision<fp32>} : vector<4x16x16xf32>, vector<4x16x16xf32>, vector<4x16x16xf32> -> vector<4x16x16xf32>
    "tpu.trace_stop"() : () -> ()
    %cst_29 = arith.constant dense<0.000000e+00> : vector<16x16xf32>
    %40 = vector.multi_reduction <add>, %39, %cst_29 [0] : vector<4x16x16xf32> to vector<16x16xf32>
    %c2_30 = arith.constant 2 : index
    %c0_31 = arith.constant 0 : index
    %c0_32 = arith.constant 0 : index
    %41 = vector.load %arg4[%c2_30, %c0_31, %c0_32] : memref<3x16x16xf32, #tpu.memory_space<vmem>>, vector<1x16x16xf32>
    %42 = vector.shape_cast %41 : vector<1x16x16xf32> to vector<16x16xf32>
    %43 = arith.mulf %40, %42 : vector<16x16xf32>
    %44 = vector.shape_cast %43 : vector<16x16xf32> to vector<1x16x16xf32>
    %cst_33 = arith.constant dense<0.000000e+00> : vector<1xf32>
    %45 = vector.multi_reduction <add>, %44, %cst_33 [1, 2] : vector<1x16x16xf32> to vector<1xf32>
    %46 = vector.shape_cast %45 : vector<1xf32> to vector<1x1x1xf32>
    %47 = vector.extract %46[0, 0, 0] : f32 from vector<1x1x1xf32>
    %48 = arith.addf %34, %47 : f32
    %c0_34 = arith.constant 0 : index
    %c0_35 = arith.constant 0 : index
    %c0_36 = arith.constant 0 : index
    %49 = vector.load %arg6[%c0_34, %c0_35, %c0_36] : memref<1x8x128xf32, #tpu.memory_space<vmem>>, vector<1x8x128xf32>
    %50 = vector.broadcast %48 : f32 to vector<1x8x128xf32>
    %51 = arith.addf %49, %50 : vector<1x8x128xf32>
    %c0_37 = arith.constant 0 : index
    %c0_38 = arith.constant 0 : index
    %c0_39 = arith.constant 0 : index
    %52 = vector.load %arg6[%c0_37, %c0_38, %c0_39] : memref<1x8x128xf32, #tpu.memory_space<vmem>>, vector<1x8x128xf32>
    tpu.vector_store %arg6[%c0_37, %c0_38, %c0_39], %51 {strides = array<i32>} : memref<1x8x128xf32, #tpu.memory_space<vmem>>, vector<1x8x128xf32>,
    return
  }
  func.func @transform_0(%arg0: i32, %arg1: i32) -> (i32, i32, i32) {
    %c1_i32 = arith.constant 1 : i32
    %0 = arith.muli %arg0, %c1_i32 : i32
    %1 = arith.addi %0, %arg1 : i32
    %c0_i32 = arith.constant 0 : i32
    %c0_i32_0 = arith.constant 0 : i32
    %c0_i32_1 = arith.constant 0 : i32
    return %1, %c0_i32, %c0_i32_0 : i32, i32, i32
  }
  func.func @transform_1(%arg0: i32, %arg1: i32) -> (i32, i32, i32) {
    %c1_i32 = arith.constant 1 : i32
    %0 = arith.muli %arg0, %c1_i32 : i32
    %1 = arith.addi %0, %arg1 : i32
    %c0_i32 = arith.constant 0 : i32
    %c0_i32_0 = arith.constant 0 : i32
    %c0_i32_1 = arith.constant 0 : i32
    return %1, %c0_i32, %c0_i32_0 : i32, i32, i32
  }
  func.func @transform_2(%arg0: i32, %arg1: i32) -> (i32, i32, i32) {
    %c0_i32 = arith.constant 0 : i32
    %c0_i32_0 = arith.constant 0 : i32
    %c0_i32_1 = arith.constant 0 : i32
    %c0_i32_2 = arith.constant 0 : i32
    return %c0_i32, %c0_i32_0, %c0_i32_1 : i32, i32, i32
  }
  func.func @transform_3(%arg0: i32, %arg1: i32) -> (i32, i32, i32) {
    %c0_i32 = arith.constant 0 : i32
    %c0_i32_0 = arith.constant 0 : i32
    %c0_i32_1 = arith.constant 0 : i32
    %c0_i32_2 = arith.constant 0 : i32
    return %c0_i32, %c0_i32_0, %c0_i32_1 : i32, i32, i32
  }
  func.func @transform_4(%arg0: i32, %arg1: i32) -> (i32, i32, i32) {
    %c0_i32 = arith.constant 0 : i32
    %c0_i32_0 = arith.constant 0 : i32
    %c0_i32_1 = arith.constant 0 : i32
    return %arg0, %c0_i32, %c0_i32_0 : i32, i32, i32
  }
}

</mosaic_0001>

<bundles_post_ra>
// kernel: tpu_custom_call.1
= control target key start
LH: loop header
LB: loop body
LE: loop exit
PB: predicated region body
PF: predicated region fallthrough
CT: control target
= control target key end

     0   :  { %s5567_s0 = inlined_call_operand.hbm [shape: f32[8,16,16], index: 0, kind: input, shape index: {}]   ;;  %s5568_s1 = inlined_call_operand.hbm [shape: f32[8,16,16], index: 1, kind: input, shape index: {}]   ;;  %s5569_s2 = inlined_call_operand.hbm [shape: f32[3,16,16], index: 2, kind: input, shape index: {}]   ;;  %s5570_s3 = inlined_call_operand.hbm [shape: f32[3,16,16], index: 3, kind: input, shape index: {}]   ;;  %s5571_s4 = inlined_call_operand.hbm [shape: f32[2,8,128], index: 4, kind: output, shape index: {}]  }
   0x1   :  { %5677 = sst [smem:[#allocation51_spill]] %s5569_s2 }
   0x2   :  { %5678 = sst [smem:[#allocation52_spill]] %s5570_s3 }
   0x3   :  { %9 = vsyncpa [#allocation3], 0 }
   0x4   :  { %11 = vsyncpa [#allocation3 + $0x1], 0 }
   0x5   :  { %12 = vsyncpa [#allocation6], 0 }
   0x6   :  { %14 = vsyncpa [#allocation6 + $0x1], 0 }
   0x7   :  { %15 = vsyncpa [#allocation9], 0 }
   0x8   :  { %16 = vsyncpa [#allocation4], 0 }
   0x9   :  { %18 = vsyncpa [#allocation4 + $0x1], 0  ;;  %s4466_s15 = smov 0   ;;  %s4468_s16 = smov 0  }
   0xa   :  { %s4470_s17 = smov 0   ;;  %s4472_s18 = smov 0  }
   0xb   :  { %s4474_s19 = smov 0   ;;  %s4476_s20 = smov 0  }
   0xc LB: > { %5679 = sst [smem:[#allocation16_spill]] %s4431_s19  ;;  %s4497_s21 = sadd.s32 4294967295, %s4435_s20   ;;  %s4435_s20 = sphi %s4476_s20, %s24_s20   ;;  %s4431_s19 = sphi %s4474_s19, %s5792_s19   ;;  %s4427_s18 = sphi %s4472_s18, %s5791_s18   ;;  %s4423_s17 = sphi %s4470_s17, %s5795_s17   ;;  %s4419_s16 = sphi %s4468_s16, %s5794_s16   ;;  %s4415_s15 = sphi %s4466_s15, %s5793_s15  }
   0xd   : > { %s4097_s22 = sadd.s32 4294967294, %s4435_s20   ;;  %p58_p0 = scmp.ne.s32.totalorder %s4419_s16, %s4415_s15 }
   0xe   : > { %p59_p1 = scmp.eq.s32.totalorder %s4497_s21, 0  ;;  %p152_p2 = scmp.eq.s32.totalorder %s4497_s21, 1 }
   0xf   : > { %p158_p3 = scmp.eq.s32.totalorder %s4097_s22, 1  ;;  %p4098_p5 = scmp.ge.s32.totalorder %s4435_s20, 1 }
  0x10   : > { %p4506_p4 = por %p59_p1, %p58_p0  ;;  %p165_p7 = scmp.lt.s32.totalorder %s4435_s20, 3 }
  0x11   : > { %p4511_p6 = por %p158_p3, %p58_p0  ;;  %s5682_s2 = sld [smem:[#allocation51_spill]] }
  0x12   : > { %p4519_p8 = pnand %p4098_p5, %p165_p7  ;;  %s4437_s29 = smov [#allocation7]  }
  0x13   : > { %s178_s30 = sshll.u32 %s4437_s29, 4  ;;  %p4101_p11 = scmp.ge.s32.totalorder %s4435_s20, 2  ;;  %s179_s30 = int_to_ptr.vmem [resolvable:$true] %s178_s30 }
  0x14   : > { %p4144_p9 = pneg %p4519_p8  ;;  %s5684_s3 = sld [smem:[#allocation52_spill]] }
  0x15   : > { %s5572_s8 = smov 128   ;;  %s5574_s9 = smov 8  }
  0x16   : > { %p4145_p10 = pnand %p4144_p9, %p59_p1  ;;  %s4440_s10 = smov [#allocation8]  }
  0x17   : > { %s176_s27 = sshll.u32 %s5682_s2, 4  ;;  %s192_s11 = sshll.u32 %s4440_s10, 4  ;;  %s177_s27 = int_to_ptr.hbm [resolvable:$true] %s176_s27  ;;  %s193_s11 = int_to_ptr.vmem [resolvable:$true] %s192_s11 }
  0x18   : > { %4147 = dma.hbm_to_vmem [thread:$0]  (!%p4145_p10), %s177_s27, 768, %s179_s30, [#allocation6], %s5572_s8, %s5572_s8, %s5574_s9  }
  0x19   : > { %s36_s12 = sadd.s32 1, %s4431_s19  ;;  %s45_s13 = sadd.s32 1, %s4423_s17 }
  0x1a   : > { %s190_s7 = sshll.u32 %s5684_s3, 4  ;;  %p38_p12 = scmp.ge.s32.totalorder %s36_s12, 2  ;;  %s191_s7 = int_to_ptr.hbm [resolvable:$true] %s190_s7 }
  0x1b   : > { %4150 = dma.hbm_to_vmem [thread:$0]  (!%p4145_p10), %s191_s7, 768, %s193_s11, [#allocation9], %s5572_s8, %s5572_s8, %s5574_s9  }
  0x1c   : > { %p52_p13 = scmp.ne.s32.totalorder %s4423_s17, %s4419_s16  ;;  %p53_p0 = scmp.eq.s32.totalorder %s4435_s20, 0 }
  0x1d   : > { %p4164_p3 = scmp.lt.s32.totalorder %s4435_s20, 2  ;;  %s5797_s12 = smov (%p38_p12, %s36_s12), 0 }
  0x1e   : > { %5685 = sst [smem:[#allocation17_spill]] %s5797_s12  ;;  %p4545_p5 = por %p53_p0, %p52_p13 }
  0x1f   : > { %p4551_p7 = por %p152_p2, %p52_p13  ;;  %s42_s25 = ssub.s32 %s4431_s19, %s5797_s12 }
  0x20   : > { %s206_s26 = sand.u32 1, %s4423_s17   ;;  %p43_p9 = scmp.eq.s32.totalorder %s42_s25, 0 }
  0x21   : > { %s4102_s27 = sshll.u32 %s206_s26, 6  ;;  %s4121_s29 = sshll.u32 %s4431_s19, 6 }
  0x22   : > { %s4560_s30 = scalar_select %p43_p9, %s4423_s17, %s45_s13  }
  0x23   : > { %s217_s7 = scalar_lea.hbm %s5567_s0, %s4121_s29  ;;  %s210_s11 = scalar_lea.vmem [#allocation2], %s4102_s27 }
  0x24   : > { %5688 = sst [smem:[#allocation18_spill]] %s4560_s30  ;;  %s218_s10 = sshll.u32 %s217_s7, 4  ;;  %s219_s10 = int_to_ptr.hbm [resolvable:$true] %s218_s10 }
  0x25   : > { %s220_s8 = sshll.u32 %s210_s11, 4  ;;  %p4152_p2 = pnand %p4164_p3, %p4545_p5  ;;  %s221_s8 = int_to_ptr.vmem [resolvable:$true] %s220_s8 }
  0x26   : > { %s241_s25 = scalar_lea.hbm %s5568_s1, %s4121_s29  ;;  %s234_s3 = scalar_lea.vmem [#allocation5], %s4102_s27 }
  0x27   : > { %s244_s13 = sshll.u32 %s234_s3, 4  ;;  %s242_s12 = sshll.u32 %s241_s25, 4  ;;  %s243_s12 = int_to_ptr.hbm [resolvable:$true] %s242_s12  ;;  %s245_s13 = int_to_ptr.vmem [resolvable:$true] %s244_s13 }
  0x28   : > { %s207_s19 = scalar_lea.sflag [#allocation3], %s206_s26  ;;  %s5689_s30 = smov 8  }
  0x29   : > { %s5690_s5 = smov 128   ;;  %s230_s6 = sand.u32 1, %s4435_s20  }
  0x2a   : > { %4154 = dma.hbm_to_vmem [thread:$0]  (!%p4152_p2), %s219_s10, 1024, %s221_s8, %s207_s19, %s5690_s5, %s5690_s5, %s5689_s30  }
  0x2b   : > { %s231_s7 = scalar_lea.sflag [#allocation6], %s230_s6  ;;  %256 = sbr.rel (%p4519_p8) target bundleno = 1339 (0x53b), region = 36 }
  0x2c   : > { %4157 = dma.hbm_to_vmem [thread:$0]  (!%p4152_p2), %s243_s12, 1024, %s245_s13, %s231_s7, %s5690_s5, %s5690_s5, %s5689_s30  }
  0x30   : > { %s4582_s2 = sand.u32 1, %s4419_s16  }
  0x31   : > { %s4111_s3 = sshll.u32 %s4582_s2, 6  ;;  %s259_s9 = scalar_lea.sflag [#allocation3], %s4582_s2 }
  0x32   : > { %s4586_s19 = scalar_lea.vmem [#allocation2], %s4111_s3 }
  0x33   : > { %4394 = dma.done.wait (%p4506_p4), %s259_s9, 1024  }
  0x34   : > { %4396 = vsyncadd (%p4506_p4), %s259_s9, 4294966272  ;;  %s268_s8 = sand.u32 1, %s4497_s21   ;;  %s4593_s12 = scalar_lea.vmem [#allocation5], %s4111_s3 }
  0x35   : > { %s269_s28 = scalar_lea.sflag [#allocation6], %s268_s8 }
  0x36   : > { %4398 = dma.done.wait (%p4506_p4), %s269_s28, 1024  }
  0x37   : > { %4400 = vsyncadd (%p4506_p4), %s269_s28, 4294966272 }
  0x38   : > { %4402 = dma.done.wait (%p59_p1), [#allocation6], 768  }
  0x39   : > { %4404 = vsyncadd (%p59_p1), [#allocation6], 4294966528 }
  0x3a   : > { %4406 = dma.done.wait (%p59_p1), [#allocation9], 768  }
  0x3b   : > { %4408 = vsyncadd (%p59_p1), [#allocation9], 4294966528  ;;  %v347_v0 = vld [vmem:[#allocation8 + $0x8] sm:$0xff]  ;;  %v346_v1 = vld [vmem:[#allocation8] sm:$0xff]  ;;  %vm348_vm0 = vcmask 130048   ;;  %s4115_s21 = sshll.u32 %s4582_s2, 3 }
  0x3c   : > { %v322_v2 = vld [vmem:[%s4586_s19] sm:$0xff]  ;;  %v387_v3 = vand.u32 4294901760, %v347_v0  ;;  %v389_v4 = vand.u32 4294901760, %v346_v1  ;;  %v323_v6 = vld [vmem:[%s4586_s19 + $0x8] sm:$0xff]  ;;  %v324_v10 = vld [vmem:[%s4586_s19 + $0x10] sm:$0xff]  ;;  %s4117_s14 = sshll.u32 %s4427_s18, 3 }
  0x3d   : > { %v330_v5 = vld [vmem:[%s4593_s12] sm:$0xff]  ;;  %v331_v7 = vld [vmem:[%s4593_s12 + $0x8] sm:$0xff]  ;;  %v332_v11 = vld [vmem:[%s4593_s12 + $0x10] sm:$0xff]  ;;  %s3969_s30 = scalar_lea.hbm %s5571_s4, %s4117_s14  ;;  %s312_s25 = scalar_lea.vmem [#allocation10], %s4115_s21 }
  0x3e   : > { %v338_v8 = vsub.f32 %v322_v2, %v330_v5  ;;  %v339_v9 = vsub.f32 %v323_v6, %v331_v7  ;;  %v471_v12 = vsub.f32 %v347_v0, %v387_v3  ;;  %v477_v13 = vsub.f32 %v346_v1, %v389_v4  ;;  %591 = vmatpush.msra.mxu3 %v387_v3  ;;  %v325_v29 = vld [vmem:[%s4586_s19 + $0x18] sm:$0xff]  ;;  %v326_v39 = vld [vmem:[%s4586_s19 + $0x20] sm:$0xff]  ;;  %v327_v48 = vld [vmem:[%s4586_s19 + $0x28] sm:$0xff]  ;;  %s3971_s13 = sshll.u32 %s312_s25, 4  ;;  %s3973_s6 = sshll.u32 %s3969_s30, 4  ;;  %s3972_s13 = int_to_ptr.vmem [resolvable:$true] %s3971_s13  ;;  %s3974_s6 = int_to_ptr.hbm [resolvable:$true] %s3973_s6 }
  0x3f   : > { %388 = vmatpush.msra.mxu0 %v387_v3  ;;  %v340_v16 = vsub.f32 %v324_v10, %v332_v11  ;;  %v333_v30 = vld [vmem:[%s4593_s12 + $0x18] sm:$0xff]  ;;  %v334_v40 = vld [vmem:[%s4593_s12 + $0x20] sm:$0xff]  ;;  %v335_v49 = vld [vmem:[%s4593_s12 + $0x28] sm:$0xff]  ;;  %s3959_s7 = scalar_lea.sflag [#allocation4], %s4582_s2  ;;  %s4355_s3 = sshra.s32 %s3974_s6, 4  ;;  %s4356_s3 = int_to_ptr.hbm [resolvable:$true] %s4355_s3 }
  0x40   : > { %v350_v14 = vsel %vm348_vm0, %v338_v8, 0  ;;  %v353_v15 = vsel %vm348_vm0, %v339_v9, 0  ;;  %531 = vmatpush.msra.mxu2 %v471_v12  ;;  %v472_v18 = vand.u32 4294901760, %v471_v12  ;;  %593 = vmatpush.msra.mxu3 %v389_v4  ;;  %v478_v19 = vand.u32 4294901760, %v477_v13  ;;  %v328_v57 = vld [vmem:[%s4586_s19 + $0x30] sm:$0xff]  ;;  %v329_v2 = vld [vmem:[%s4586_s19 + $0x38] sm:$0xff]  ;;  %p4362_p10 = scmp.lt.s32.totalorder %s4356_s3, %s5571_s4 }
  0x41   : > { %v4615_v17 = vand.u32 4294901760, %v350_v14  ;;  %v4617_v20 = vand.u32 4294901760, %v353_v15  ;;  %390 = vmatpush.msra.mxu0 %v389_v4  ;;  %v356_v25 = vsel %vm348_vm0, %v340_v16, 0  ;;  %v341_v34 = vsub.f32 %v325_v29, %v333_v30  ;;  %v336_v58 = vld [vmem:[%s4593_s12 + $0x30] sm:$0xff]  ;;  %s4357_s18 = scalar_lea.hbm %s4356_s3, 8  ;;  %s4361_s8 = scalar_lea.hbm %s5571_s4, 16 }
  0x42   : > { %534 = vmatpush.msra.mxu2 %v477_v13  ;;  %v473_v22 = vsub.f32 %v471_v12, %v472_v18  ;;  %v479_v23 = vsub.f32 %v477_v13, %v478_v19  ;;  %v4638_v33 = vand.u32 4294901760, %v356_v25  ;;  %v342_v44 = vsub.f32 %v326_v39, %v334_v40  ;;  %p4358_p1 = scmp.ne.s32.totalorder %s4356_s3, %s4357_s18  ;;  %p4363_p12 = scmp.lt.s32.totalorder %s4361_s8, %s4357_s18 }
  0x43   : > { %5691 = vst [vmem:[#allocation19_spill] sm:$0xff] %v4615_v17  ;;  %v4620_v21 = vsub.f32 %v350_v14, %v4615_v17  ;;  %v4623_v24 = vsub.f32 %v353_v15, %v4617_v20  ;;  %660 = vmatpush.msrb.mxu0 %v472_v18  ;;  %v359_v38 = vsel %vm348_vm0, %v341_v34, 0  ;;  %v343_v53 = vsub.f32 %v327_v48, %v335_v49 }
  0x44   : > { %5692 = vst [vmem:[#allocation20_spill] sm:$0xff] %v4617_v20  ;;  %v474_v26 = vand.u32 4294901760, %v473_v22  ;;  %v480_v28 = vand.u32 4294901760, %v479_v23  ;;  %v4647_v37 = vsub.f32 %v356_v25, %v4638_v33  ;;  %v4659_v43 = vand.u32 4294901760, %v359_v38  ;;  %p4359_p4 = pnand %p4358_p1, %p4551_p7  ;;  %p4364_p13 = por %p4363_p12, %p4362_p10 }
  0x45   : > { %5693 = vst [vmem:[#allocation21_spill] sm:$0xff] %v4620_v21  ;;  %537 = vmatmul.f32.vlgmr.msra.gmra.mxu2 %v4620_v21  ;;  %v4628_v27 = vand.u32 4294901760, %v4620_v21  ;;  %664 = vmatpush.msrb.mxu0 %v478_v19  ;;  %v4636_v32 = vand.u32 4294901760, %v4623_v24  ;;  %v362_v47 = vsel %vm348_vm0, %v342_v44, 0  ;;  %v365_v56 = vsel %vm348_vm0, %v343_v53, 0 }
  0x46   : > { %5694 = vst [vmem:[#allocation22_spill] sm:$0xff] %v4623_v24  ;;  %475 = vmatpush.msra.mxu1 %v474_v26  ;;  %v4657_v42 = vand.u32 4294901760, %v4647_v37  ;;  %v4666_v46 = vsub.f32 %v359_v38, %v4659_v43  ;;  %v4678_v52 = vand.u32 4294901760, %v362_v47  ;;  %v4697_v61 = vand.u32 4294901760, %v365_v56  ;;  %p4360_p8 = pneg %p4359_p4 }
  0x47   : > { %5695 = vst [vmem:[#allocation23_spill] sm:$0xff] %v4628_v27  ;;  %597 = vmatmul.f32.vlgmr.msra.gmra.mxu3 %v4628_v27  ;;  %v394_v31 = vsub.f32 %v4620_v21, %v4628_v27  ;;  %v402_v36 = vsub.f32 %v4623_v24, %v4636_v32  ;;  %v344_v62 = vsub.f32 %v328_v57, %v336_v58 }
  0x48   : > { %5696 = vst [vmem:[#allocation24_spill] sm:$0xff] %v4636_v32  ;;  %481 = vmatpush.msra.mxu1 %v480_v28  ;;  %v410_v45 = vsub.f32 %v4647_v37, %v4657_v42  ;;  %v4676_v51 = vand.u32 4294901760, %v4666_v46  ;;  %v4685_v55 = vsub.f32 %v362_v47, %v4678_v52  ;;  %v4704_v0 = vsub.f32 %v365_v56, %v4697_v61  ;;  %p4365_p0 = pnand %p4364_p13, %p4360_p8 }
  0x49   : > { %5697 = vst [vmem:[#allocation25_spill] sm:$0xff] %v4638_v33  ;;  %v4640_v35 = vand.u32 4294901760, %v394_v31  ;;  %483 = vmatmul.f32.vlgmr.msra.gmra.mxu1 %v4615_v17  ;;  %v4654_v41 = vand.u32 4294901760, %v402_v36  ;;  %v368_v1 = vsel %vm348_vm0, %v344_v62, 0 }
  0x4a   : > { %5699 = vst [vmem:[#allocation27_spill] sm:$0xff] %v4647_v37  ;;  %713 = vmatpush.msrb.mxu1 %v387_v3  ;;  %v4673_v50 = vand.u32 4294901760, %v410_v45  ;;  %v418_v54 = vsub.f32 %v4666_v46, %v4676_v51  ;;  %v4695_v60 = vand.u32 4294901760, %v4685_v55  ;;  %v337_v3 = vld [vmem:[%s4593_s12 + $0x38] sm:$0xff]  ;;  %v4714_v5 = vand.u32 4294901760, %v4704_v0 }
  0x4b   : > { %5698 = vst [vmem:[#allocation26_spill] sm:$0xff] %v4640_v35  ;;  %396 = vmatmul.f32.vlgmr.msra.gmra.mxu0 %v4640_v35  ;;  %v4716_v6 = vand.u32 4294901760, %v368_v1  ;;  %v345_v7 = vsub.f32 %v329_v2, %v337_v3 }
  0x4c   : > { %715 = vmatpush.msrb.mxu1 %v389_v4  ;;  %5700 = vst [vmem:[#allocation28_spill] sm:$0xff] %v4654_v41  ;;  %v4692_v59 = vand.u32 4294901760, %v418_v54  ;;  %v426_v63 = vsub.f32 %v4685_v55, %v4695_v60  ;;  %v434_v8 = vsub.f32 %v4704_v0, %v4714_v5 }
  0x4d   : > { %542 = vmatmul.f32.gmra.mxu2 %v4623_v24  ;;  %5701 = vst [vmem:[#allocation29_spill] sm:$0xff] %v4657_v42  ;;  %v4723_v9 = vsub.f32 %v368_v1, %v4716_v6  ;;  %v371_v10 = vsel %vm348_vm0, %v345_v7, 0 }
  0x4e   : > { %5702 = vst [vmem:[#allocation30_spill] sm:$0xff] %v4659_v43  ;;  %v4711_v4 = vand.u32 4294901760, %v426_v63  ;;  %v4728_v11 = vand.u32 4294901760, %v434_v8  ;;  %v4733_v13 = vand.u32 4294901760, %v371_v10 }
  0x4f   : > { %603 = vmatmul.f32.gmra.mxu3 %v4636_v32  ;;  %5703 = vst [vmem:[#allocation31_spill] sm:$0xff] %v4666_v46  ;;  %v4731_v12 = vand.u32 4294901760, %v4723_v9 }
  0x50   : > { %5704 = vst [vmem:[#allocation32_spill] sm:$0xff] %v4673_v50  ;;  %v4740_v15 = vsub.f32 %v371_v10, %v4733_v13 }
  0x51   : > { %487 = vmatmul.f32.gmra.mxu1 %v4617_v20  ;;  %5705 = vst [vmem:[#allocation33_spill] sm:$0xff] %v4676_v51  ;;  %v442_v14 = vsub.f32 %v4723_v9, %v4731_v12 }
  0x52   : > { %5706 = vst [vmem:[#allocation34_spill] sm:$0xff] %v4678_v52  ;;  %v4747_v18 = vand.u32 4294901760, %v4740_v15 }
  0x53   : > { %404 = vmatmul.f32.gmra.mxu0 %v4654_v41  ;;  %5707 = vst [vmem:[#allocation35_spill] sm:$0xff] %v4685_v55  ;;  %v4744_v16 = vand.u32 4294901760, %v442_v14 }
  0x54   : > { %5708 = vst [vmem:[#allocation36_spill] sm:$0xff] %v4692_v59  ;;  %v450_v19 = vsub.f32 %v4740_v15, %v4747_v18 }
  0x55   : > { %547 = vmatmul.f32.gmra.mxu2 %v4647_v37  ;;  %5709 = vst [vmem:[#allocation37_spill] sm:$0xff] %v4695_v60 }
  0x56   : > { %5710 = vst [vmem:[#allocation38_spill] sm:$0xff] %v4697_v61  ;;  %v4755_v22 = vand.u32 4294901760, %v450_v19 }
  0x57   : > { %609 = vmatmul.f32.gmra.mxu3 %v4657_v42  ;;  %5711 = vst [vmem:[#allocation39_spill] sm:$0xff] %v4704_v0 }
  0x58   : > { %5712 = vst [vmem:[#allocation40_spill] sm:$0xff] %v4711_v4 }
  0x59   : > { %491 = vmatmul.f32.gmra.mxu1 %v4638_v33  ;;  %5713 = vst [vmem:[#allocation41_spill] sm:$0xff] %v4714_v5 }
  0x5a   : > { %5714 = vst [vmem:[#allocation42_spill] sm:$0xff] %v4716_v6 }
  0x5b   : > { %412 = vmatmul.f32.gmra.mxu0 %v4673_v50  ;;  %5715 = vst [vmem:[#allocation43_spill] sm:$0xff] %v4723_v9 }
  0x5c   : > { %5716 = vst [vmem:[#allocation44_spill] sm:$0xff] %v4728_v11 }
  0x5d   : > { %552 = vmatmul.f32.gmra.mxu2 %v4666_v46  ;;  %5717 = vst [vmem:[#allocation45_spill] sm:$0xff] %v4731_v12 }
  0x5e   : > { %5718 = vst [vmem:[#allocation46_spill] sm:$0xff] %v4733_v13 }
  0x5f   : > { %615 = vmatmul.f32.gmra.mxu3 %v4676_v51  ;;  %5719 = vst [vmem:[#allocation47_spill] sm:$0xff] %v4740_v15 }
  0x60   : > { %5720 = vst [vmem:[#allocation48_spill] sm:$0xff] %v4744_v16 }
  0x61   : > { %495 = vmatmul.f32.gmra.mxu1 %v4659_v43  ;;  %5721 = vst [vmem:[#allocation49_spill] sm:$0xff] %v4747_v18 }
  0x62   : > { %5722 = vst [vmem:[#allocation50_spill] sm:$0xff] %v4755_v22 }
  0x63   : > { %420 = vmatmul.f32.gmra.mxu0 %v4692_v59 }
  0x65   : > { %557 = vmatmul.f32.gmra.mxu2 %v4685_v55 }
  0x67   : > { %621 = vmatmul.f32.gmra.mxu3 %v4695_v60 }
  0x69   : > { %499 = vmatmul.f32.gmra.mxu1 %v4678_v52 }
  0x6b   : > { %428 = vmatmul.f32.gmra.mxu0 %v4711_v4 }
  0x6d   : > { %562 = vmatmul.f32.gmra.mxu2 %v4704_v0 }
  0x6f   : > { %627 = vmatmul.f32.gmra.mxu3 %v4714_v5 }
  0x71   : > { %503 = vmatmul.f32.gmra.mxu1 %v4697_v61 }
  0x73   : > { %436 = vmatmul.f32.gmra.mxu0 %v4728_v11 }
  0x75   : > { %567 = vmatmul.f32.gmra.mxu2 %v4723_v9 }
  0x77   : > { %633 = vmatmul.f32.gmra.mxu3 %v4731_v12 }
  0x79   : > { %507 = vmatmul.f32.gmra.mxu1 %v4716_v6 }
  0x7b   : > { %444 = vmatmul.f32.gmra.mxu0 %v4744_v16 }
  0x7d   : > { %572 = vmatmul.f32.gmra.mxu2 %v4740_v15 }
  0x7f   : > { %639 = vmatmul.f32.gmra.mxu3 %v4747_v18 }
  0x81   : > { %511 = vmatmul.f32.gmra.mxu1 %v4733_v13 }
  0x83   : > { %452 = vmatmul.f32.gmra.mxu0 %v4755_v22 }
  0x89   : > { %717 = vmatmul.f32.vlgmr.msrb.gmra.mxu1 %v4615_v17 }
  0x8b   : > { %666 = vmatmul.f32.vlgmr.msrb.gmra.mxu0 %v4615_v17 }
  0x91   : > { %721 = vmatmul.f32.gmra.mxu1 %v4617_v20 }
  0x93   : > { %670 = vmatmul.f32.gmra.mxu0 %v4617_v20 }
  0x99   : > { %725 = vmatmul.f32.gmra.mxu1 %v4638_v33 }
  0x9b   : > { %674 = vmatmul.f32.gmra.mxu0 %v4638_v33 }
  0xa1   : > { %729 = vmatmul.f32.gmra.mxu1 %v4659_v43 }
  0xa3   : > { %678 = vmatmul.f32.gmra.mxu0 %v4659_v43 }
  0xa9   : > { %733 = vmatmul.f32.gmra.mxu1 %v4678_v52 }
  0xab   : > { %682 = vmatmul.f32.gmra.mxu0 %v4678_v52 }
  0xb1   : > { %737 = vmatmul.f32.gmra.mxu1 %v4697_v61 }
  0xb3   : > { %686 = vmatmul.f32.gmra.mxu0 %v4697_v61 }
  0xb9   : > { %741 = vmatmul.f32.gmra.mxu1 %v4716_v6 }
  0xbb   : > { %690 = vmatmul.f32.gmra.mxu0 %v4716_v6 }
  0xc1   : > { %745 = vmatmul.f32.gmra.mxu1 %v4733_v13 }
  0xc3   : > { %694 = vmatmul.f32.gmra.mxu0 %v4733_v13 }
  0xc6   : > { %v484_v23 = vpop.f32.mrf.mxu1 }
  0xc8   : > { %v397_v25 = vpop.f32.mrf.mxu0  ;;  %v538_v44 = vpop.f32.mrf.mxu2 }
  0xc9   : > { %v485_v53 = vadd.f32 %v484_v23, %v397_v25 }
  0xca   : > { %v598_v45 = vpop.f32.mrf.mxu3 }
  0xcb   : > { %v539_v58 = vadd.f32 %v538_v44, %v485_v53 }
  0xcd   : > { %v599_v63 = vadd.f32 %v598_v45, %v539_v58 }
  0xce   : > { %v488_v26 = vpop.f32.mrf.mxu1 }
  0xd0   : > { %v405_v28 = vpop.f32.mrf.mxu0  ;;  %v543_v49 = vpop.f32.mrf.mxu2 }
  0xd1   : > { %v489_v1 = vadd.f32 %v488_v26, %v405_v28 }
  0xd2   : > { %v604_v56 = vpop.f32.mrf.mxu3 }
  0xd3   : > { %v544_v10 = vadd.f32 %v543_v49, %v489_v1 }
  0xd5   : > { %v605_v19 = vadd.f32 %v604_v56, %v544_v10 }
  0xd6   : > { %v492_v29 = vpop.f32.mrf.mxu1 }
  0xd8   : > { %v413_v30 = vpop.f32.mrf.mxu0  ;;  %v548_v62 = vpop.f32.mrf.mxu2 }
  0xd9   : > { %v493_v5 = vadd.f32 %v492_v29, %v413_v30 }
  0xda   : > { %v610_v8 = vpop.f32.mrf.mxu3 }
  0xdb   : > { %v549_v58 = vadd.f32 %v548_v62, %v493_v5 }
  0xdd   : > { %v611_v10 = vadd.f32 %v610_v8, %v549_v58 }
  0xde   : > { %v496_v31 = vpop.f32.mrf.mxu1 }
  0xe0   : > { %v421_v34 = vpop.f32.mrf.mxu0  ;;  %v553_v23 = vpop.f32.mrf.mxu2 }
  0xe1   : > { %v497_v49 = vadd.f32 %v496_v31, %v421_v34 }
  0xe2   : > { %v616_v53 = vpop.f32.mrf.mxu3 }
  0xe6   : > { %v500_v36 = vpop.f32.mrf.mxu1 }
  0xe8   : > { %v429_v38 = vpop.f32.mrf.mxu0 }
  0xe9   : > { %v501_v5 = vadd.f32 %v500_v36, %v429_v38 }
  0xea   : > { %v622_v29 = vpop.f32.mrf.mxu3 }
  0xee   : > { %v4775_v39 = vpop.f32.mrf.mxu1 }
  0xf0   : > { %v4777_v40 = vpop.f32.mrf.mxu0 }
  0xf6   : > { %v4779_v47 = vpop.f32.mrf.mxu1 }
  0xf8   : > { %v4781_v48 = vpop.f32.mrf.mxu0 }
  0xfe   : > { %v4783_v54 = vpop.f32.mrf.mxu1 }
 0x100   : > { %v4785_v57 = vpop.f32.mrf.mxu0 }
 0x106   : > { %v718_v2 = vpop.f32.mrf.mxu1 }
 0x108   : > { %v667_v3 = vpop.f32.mrf.mxu0 }
 0x109   : > { %v668_v7 = vadd.f32 %v667_v3, %v599_v63 }
 0x10b   : > { %v719_v14 = vadd.f32 %v718_v2, %v668_v7  ;;  %v558_v2 = vpop.f32.mrf.mxu2 }
 0x10d   : > { %v750_v13 = vsel %vm348_vm0, %v719_v14, 0  ;;  %v554_v14 = vadd.f32 %v553_v23, %v497_v49  ;;  %v559_v23 = vadd.f32 %v558_v2, %v501_v5 }
 0x10e   : > { %v722_v6 = vpop.f32.mrf.mxu1  ;;  %v4788_v16 = vand.u32 4294901760, %v750_v13 }
 0x10f   : > { %v623_v38 = vadd.f32 %v622_v29, %v559_v23 }
 0x110   : > { %v671_v25 = vpop.f32.mrf.mxu0  ;;  %v811_v45 = vsub.f32 %v750_v13, %v4788_v16  ;;  %v617_v13 = vadd.f32 %v616_v53, %v554_v14  ;;  %v505_v53 = vadd.f32 %v4775_v39, %v4777_v40 }
 0x111   : > { %v672_v22 = vadd.f32 %v671_v25, %v605_v19 }
 0x112   : > { %v812_v7 = vand.u32 4294901760, %v811_v45 }
 0x113   : > { %v723_v44 = vadd.f32 %v722_v6, %v672_v22 }
 0x114   : > { %v813_v19 = vsub.f32 %v811_v45, %v812_v7 }
 0x115   : > { %v753_v26 = vsel %vm348_vm0, %v723_v44, 0 }
 0x116   : > { %v769_v28 = vand.u32 4294901760, %v753_v26  ;;  %v726_v63 = vpop.f32.mrf.mxu1  ;;  %v814_v8 = vand.u32 4294901760, %v813_v19 }
 0x118   : > { %v805_v56 = vsub.f32 %v753_v26, %v769_v28  ;;  %v675_v1 = vpop.f32.mrf.mxu0  ;;  %770 = vmatpush.xpose.msrb.mxu2 %v769_v28  ;;  %v563_v26 = vpop.f32.mrf.mxu2 }
 0x119   : > { %v676_v22 = vadd.f32 %v675_v1, %v611_v10  ;;  %v564_v39 = vadd.f32 %v563_v26, %v505_v53 }
 0x11a   : > { %v806_v3 = vand.u32 4294901760, %v805_v56 }
 0x11b   : > { %v727_v62 = vadd.f32 %v726_v63, %v676_v22  ;;  %v628_v63 = vpop.f32.mrf.mxu3 }
 0x11c   : > { %772 = vmatpush.xpose.msrb.mxu2 %v4788_v16  ;;  %v807_v6 = vsub.f32 %v805_v56, %v806_v3 }
 0x11d   : > { %v946_v58 = vsel %vm348_vm0, %v727_v62, 0 }
 0x11e   : > { %v808_v30 = vand.u32 4294901760, %v807_v6  ;;  %v730_v31 = vpop.f32.mrf.mxu1  ;;  %v629_v6 = vadd.f32 %v628_v63, %v564_v39 }
 0x11f   : > { %778 = vmatmul.f32.vlgmr.msrb.gmra.mxu2 %v4640_v35 }
 0x120   : > { %841 = vmatpush.xpose.msra.mxu2 %v805_v56  ;;  %v679_v34 = vpop.f32.mrf.mxu0  ;;  %809 = vmatpush.xpose.msrb.mxu3 %v808_v30  ;;  %v4802_v56 = vand.u32 4294901760, %v946_v58  ;;  %v568_v10 = vpop.f32.mrf.mxu2 }
 0x121   : > { %v680_v25 = vadd.f32 %v679_v34, %v617_v13 }
 0x123   : > { %v731_v44 = vadd.f32 %v730_v31, %v680_v25  ;;  %v634_v19 = vpop.f32.mrf.mxu3  ;;  %v509_v31 = vadd.f32 %v4779_v47, %v4781_v48 }
 0x124   : > { %844 = vmatpush.xpose.msra.mxu2 %v811_v45  ;;  %815 = vmatpush.xpose.msrb.mxu3 %v814_v8 }
 0x125   : > { %v949_v49 = vsel %vm348_vm0, %v731_v44, 0  ;;  %v569_v26 = vadd.f32 %v568_v10, %v509_v31 }
 0x126   : > { %v4796_v36 = vand.u32 4294901760, %v949_v49  ;;  %v734_v45 = vpop.f32.mrf.mxu1 }
 0x127   : > { %786 = vmatmul.f32.gmra.mxu2 %v4654_v41  ;;  %817 = vmatmul.f32.vlgmr.msrb.gmra.mxu3 %v4615_v17 }
 0x128   : > { %904 = vmatpush.xpose.msrb.mxu2 %v806_v3  ;;  %871 = vmatpush.xpose.msra.mxu3 %v769_v28  ;;  %v4805_v1 = vsub.f32 %v949_v49, %v4796_v36  ;;  %v683_v2 = vpop.f32.mrf.mxu0  ;;  %v573_v48 = vpop.f32.mrf.mxu2 }
 0x129   : > { %1067 = vmatpush.xpose.msra.mxu1 %v4796_v36  ;;  %v684_v3 = vadd.f32 %v683_v2, %v623_v38 }
 0x12a   : > { %1037 = vmatpush.xpose.msra.mxu0 %v4805_v1  ;;  %v1002_v14 = vand.u32 4294901760, %v4805_v1 }
 0x12b   : > { %v735_v40 = vadd.f32 %v734_v45, %v684_v3 }
 0x12c   : > { %908 = vmatpush.xpose.msrb.mxu2 %v812_v7  ;;  %873 = vmatpush.xpose.msra.mxu3 %v4788_v16  ;;  %v4812_v7 = vsub.f32 %v946_v58, %v4802_v56  ;;  %v1003_v13 = vsub.f32 %v4805_v1, %v1002_v14  ;;  %v513_v58 = vadd.f32 %v4783_v54, %v4785_v57  ;;  %v640_v1 = vpop.f32.mrf.mxu3 }
 0x12d   : > { %1069 = vmatpush.xpose.msra.mxu1 %v4802_v56  ;;  %v1142_v22 = vsel %vm348_vm0, %v735_v40, 0  ;;  %v635_v57 = vadd.f32 %v634_v19, %v569_v26 }
 0x12e   : > { %1040 = vmatpush.xpose.msra.mxu0 %v4812_v7  ;;  %v1008_v5 = vand.u32 4294901760, %v4812_v7  ;;  %v1004_v23 = vand.u32 4294901760, %v1003_v13  ;;  %v574_v63 = vadd.f32 %v573_v48, %v513_v58 }
 0x12f   : > { %821 = vmatmul.f32.gmra.mxu3 %v4617_v20  ;;  %847 = vmatmul.f32.vlgmr.msra.gmra.mxu2 %v4620_v21 }
 0x130   : > { %933 = vmatpush.xpose.msrb.mxu3 %v769_v28  ;;  %v738_v28 = vpop.f32.mrf.mxu1  ;;  %966 = vmatpush.xpose.msra.mxu2 %v4796_v36  ;;  %v687_v29 = vpop.f32.mrf.mxu0  ;;  %v1009_v44 = vsub.f32 %v4812_v7, %v1008_v5  ;;  %v641_v7 = vadd.f32 %v640_v1, %v574_v63  ;;  %v5723_v63 = vld [vmem:[#allocation41_spill] sm:$0xff]  ;;  %v5724_v1 = vld [vmem:[#allocation48_spill] sm:$0xff] }
 0x131   : > { %1073 = vmatmul.f32.vlgmr.msra.gmra.mxu1 %v4657_v42  ;;  %v688_v30 = vadd.f32 %v687_v29, %v629_v6  ;;  %1043 = vmatmul.f32.vlgmr.msra.gmra.mxu0 %v4647_v37 }
 0x132   : > { %v1010_v53 = vand.u32 4294901760, %v1009_v44  ;;  %v1565_v44 = vld [vmem:[#allocation8 + $0x10] sm:$0xff] }
 0x133   : > { %v739_v34 = vadd.f32 %v738_v28, %v688_v30  ;;  %v4876_v26 = vand.u32 4294901760, %v1565_v44 }
 0x134   : > { %935 = vmatpush.xpose.msrb.mxu3 %v4788_v16  ;;  %v4823_v16 = vand.u32 4294901760, %v1142_v22  ;;  %968 = vmatpush.xpose.msra.mxu2 %v4802_v56 }
 0x135   : > { %v1145_v62 = vsel %vm348_vm0, %v739_v34, 0 }
 0x136   : > { %v4832_v25 = vsub.f32 %v1142_v22, %v4823_v16  ;;  %v4834_v8 = vand.u32 4294901760, %v1145_v62 }
 0x137   : > { %852 = vmatmul.f32.gmra.mxu2 %v4623_v24  ;;  %877 = vmatmul.f32.vlgmr.msra.gmra.mxu3 %v4628_v27 }
 0x138   : > { %v742_v47 = vpop.f32.mrf.mxu1  ;;  %v1197_v49 = vsub.f32 %v1145_v62, %v4834_v8  ;;  %1005 = vmatpush.xpose.msra.mxu3 %v1004_v23  ;;  %v691_v38 = vpop.f32.mrf.mxu0  ;;  %1162 = vmatpush.xpose.msrb.mxu0 %v4834_v8  ;;  %v1204_v54 = vand.u32 4294901760, %v4832_v25 }
 0x139   : > { %1048 = vmatmul.f32.gmra.mxu0 %v4666_v46  ;;  %1079 = vmatmul.f32.gmra.mxu1 %v4676_v51  ;;  %v692_v3 = vadd.f32 %v691_v38, %v635_v57 }
 0x13a   : > { %v1198_v45 = vand.u32 4294901760, %v1197_v49  ;;  %v1205_v40 = vsub.f32 %v4832_v25, %v1204_v54 }
 0x13b   : > { %v743_v22 = vadd.f32 %v742_v47, %v692_v3  ;;  %v1671_v47 = vsub.f32 %v1565_v44, %v4876_v26  ;;  %v5726_v3 = vld [vmem:[#allocation42_spill] sm:$0xff] }
 0x13c   : > { %1011 = vmatpush.xpose.msra.mxu3 %v1010_v53  ;;  %1164 = vmatpush.xpose.msrb.mxu0 %v4823_v16  ;;  %v1199_v2 = vsub.f32 %v1197_v49, %v1198_v45  ;;  %v1206_v29 = vand.u32 4294901760, %v1205_v40 }
 0x13d   : > { %v1338_v19 = vsel %vm348_vm0, %v743_v22, 0  ;;  %v1672_v48 = vand.u32 4294901760, %v1671_v47 }
 0x13e   : > { %v1200_v39 = vand.u32 4294901760, %v1199_v2  ;;  %v5725_v2 = vld [vmem:[#allocation50_spill] sm:$0xff] }
 0x13f   : > { %883 = vmatmul.f32.gmra.mxu3 %v4636_v32  ;;  %910 = vmatmul.f32.vlgmr.msrb.gmra.mxu2 %v4615_v17  ;;  %v1673_v38 = vsub.f32 %v1671_v47, %v1672_v48 }
 0x140   : > { %1296 = vmatpush.xpose.msra.mxu0 %v1198_v45  ;;  %1100 = vmatpush.xpose.msrb.mxu2 %v1002_v14  ;;  %v695_v10 = vpop.f32.mrf.mxu0  ;;  %v746_v6 = vpop.f32.mrf.mxu1  ;;  %v4858_v14 = vand.u32 4294901760, %v1338_v19 }
 0x141   : > { %1201 = vmatpush.xpose.msrb.mxu1 %v1200_v39  ;;  %v696_v28 = vadd.f32 %v695_v10, %v641_v7  ;;  %1170 = vmatmul.f32.vlgmr.msrb.gmra.mxu0 %v4711_v4  ;;  %v1674_v45 = vand.u32 4294901760, %v1673_v38  ;;  %v5727_v39 = vld [vmem:[#allocation46_spill] sm:$0xff] }
 0x142   : > { %v1399_v23 = vsub.f32 %v1338_v19, %v4858_v14 }
 0x143   : > { %v747_v30 = vadd.f32 %v746_v6, %v696_v28 }
 0x144   : > { %1300 = vmatpush.xpose.msra.mxu0 %v1204_v54  ;;  %1104 = vmatpush.xpose.msrb.mxu2 %v1008_v5  ;;  %v1566_v5 = vld [vmem:[#allocation8 + $0x18] sm:$0xff] }
 0x145   : > { %1207 = vmatpush.xpose.msrb.mxu1 %v1206_v29  ;;  %v1341_v13 = vsel %vm348_vm0, %v747_v30, 0  ;;  %v4869_v62 = vand.u32 4294901760, %v1566_v5 }
 0x146   : > { %v4854_v31 = vand.u32 4294901760, %v1341_v13 }
 0x147   : > { %914 = vmatmul.f32.gmra.mxu2 %v4617_v20  ;;  %937 = vmatmul.f32.vlgmr.msrb.gmra.mxu3 %v4615_v17 }
 0x148   : > { %v4861_v34 = vsub.f32 %v1341_v13, %v4854_v31  ;;  %1129 = vmatpush.xpose.msrb.mxu3 %v4796_v36  ;;  %1209 = vmatmul.f32.vlgmr.msrb.gmra.mxu1 %v4678_v52  ;;  %v4874_v36 = vsub.f32 %v1566_v5, %v4869_v62 }
 0x149   : > { %1325 = vmatpush.xpose.msra.mxu1 %v4834_v8  ;;  %1178 = vmatmul.f32.gmra.mxu0 %v4728_v11 }
 0x14a   : > { %1429 = vmatpush.xpose.msrb.mxu0 %v4861_v34  ;;  %v1666_v58 = vand.u32 4294901760, %v4874_v36 }
 0x14c   : > { %1131 = vmatpush.xpose.msrb.mxu3 %v4802_v56  ;;  %v1667_v56 = vsub.f32 %v4874_v36, %v1666_v58 }
 0x14d   : > { %1327 = vmatpush.xpose.msra.mxu1 %v4823_v16 }
 0x14e   : > { %1432 = vmatpush.xpose.msrb.mxu0 %v1399_v23  ;;  %v1668_v53 = vand.u32 4294901760, %v1667_v56 }
 0x14f   : > { %941 = vmatmul.f32.gmra.mxu3 %v4617_v20  ;;  %974 = vmatmul.f32.vlgmr.msra.gmra.mxu2 %v4673_v50 }
 0x150   : > { %1213 = vmatmul.f32.gmra.mxu1 %v4697_v61  ;;  %1233 = vmatpush.xpose.msra.mxu2 %v1197_v49  ;;  %v1400_v49 = vand.u32 4294901760, %v1399_v23 }
 0x151   : > { %1459 = vmatpush.xpose.msrb.mxu1 %v4854_v31  ;;  %1302 = vmatmul.f32.vlgmr.msra.gmra.mxu0 %v4678_v52 }
 0x152   : > { %1582 = vmatpush.msra.mxu0 %v4869_v62  ;;  %v1401_v54 = vsub.f32 %v1399_v23, %v1400_v49 }
 0x154   : > { %1236 = vmatpush.xpose.msra.mxu2 %v4832_v25  ;;  %1584 = vmatpush.msra.mxu0 %v4876_v26  ;;  %v1394_v25 = vand.u32 4294901760, %v4861_v34  ;;  %v1402_v57 = vand.u32 4294901760, %v1401_v54 }
 0x155   : > { %1461 = vmatpush.xpose.msrb.mxu1 %v4858_v14 }
 0x157   : > { %982 = vmatmul.f32.gmra.mxu2 %v4692_v59  ;;  %1013 = vmatmul.f32.vlgmr.msra.gmra.mxu3 %v4638_v33 }
 0x158   : > { %1263 = vmatpush.xpose.msra.mxu3 %v4834_v8  ;;  %1329 = vmatmul.f32.vlgmr.msra.gmra.mxu1 %v4678_v52  ;;  %v1395_v8 = vsub.f32 %v4861_v34, %v1394_v25 }
 0x159   : > { %1306 = vmatmul.f32.gmra.mxu0 %v4697_v61  ;;  %1669 = vmatpush.msra.mxu1 %v1668_v53 }
 0x15b   : > { %1675 = vmatpush.msra.mxu1 %v1674_v45 }
 0x15c   : > { %1265 = vmatpush.xpose.msra.mxu3 %v4823_v16  ;;  %v1396_v16 = vand.u32 4294901760, %v1395_v8 }
 0x15f   : > { %1017 = vmatmul.f32.gmra.mxu3 %v4659_v43  ;;  %1106 = vmatmul.f32.vlgmr.msrb.gmra.mxu2 %v4638_v33 }
 0x160   : > { %1333 = vmatmul.f32.gmra.mxu1 %v4697_v61  ;;  %1358 = vmatpush.xpose.msrb.mxu2 %v4854_v31 }
 0x161   : > { %1435 = vmatmul.f32.vlgmr.msrb.gmra.mxu0 %v4723_v9 }
 0x162   : > { %1854 = vmatpush.msrb.mxu0 %v1666_v58 }
 0x164   : > { %1360 = vmatpush.xpose.msrb.mxu2 %v4858_v14  ;;  %1858 = vmatpush.msrb.mxu0 %v1672_v48 }
 0x167   : > { %1110 = vmatmul.f32.gmra.mxu2 %v4659_v43  ;;  %1133 = vmatmul.f32.vlgmr.msrb.gmra.mxu3 %v4638_v33 }
 0x168   : > { %1397 = vmatpush.xpose.msrb.mxu3 %v1396_v16  ;;  %1465 = vmatmul.f32.vlgmr.msrb.gmra.mxu1 %v4731_v12 }
 0x169   : > { %1440 = vmatmul.f32.gmra.mxu0 %v4740_v15  ;;  %1907 = vmatpush.msrb.mxu1 %v4869_v62 }
 0x16b   : > { %1909 = vmatpush.msrb.mxu1 %v4876_v26 }
 0x16c   : > { %1403 = vmatpush.xpose.msrb.mxu3 %v1402_v57 }
 0x16f   : > { %1137 = vmatmul.f32.gmra.mxu3 %v4659_v43  ;;  %1239 = vmatmul.f32.vlgmr.msra.gmra.mxu2 %v4685_v55 }
 0x170   : > { %1471 = vmatmul.f32.gmra.mxu1 %v4747_v18  ;;  %1492 = vmatpush.xpose.msra.mxu2 %v1394_v25 }
 0x171   : > { %1590 = vmatmul.f32.vlgmr.msra.gmra.mxu0 %v4640_v35 }
 0x174   : > { %1496 = vmatpush.xpose.msra.mxu2 %v1400_v49 }
 0x177   : > { %1244 = vmatmul.f32.gmra.mxu2 %v4704_v0  ;;  %1269 = vmatmul.f32.vlgmr.msra.gmra.mxu3 %v4695_v60 }
 0x178   : > { %1521 = vmatpush.xpose.msra.mxu3 %v4854_v31  ;;  %1677 = vmatmul.f32.vlgmr.msra.gmra.mxu1 %v4615_v17 }
 0x179   : > { %1598 = vmatmul.f32.gmra.mxu0 %v4654_v41 }
 0x17c   : > { %1523 = vmatpush.xpose.msra.mxu3 %v4858_v14 }
 0x17f   : > { %1275 = vmatmul.f32.gmra.mxu3 %v5723_v63  ;;  %1366 = vmatmul.f32.vlgmr.msrb.gmra.mxu2 %v5724_v1 }
 0x180   : > { %1681 = vmatmul.f32.gmra.mxu1 %v4617_v20  ;;  %1725 = vmatpush.msrb.mxu2 %v4874_v36 }
 0x181   : > { %1606 = vmatmul.f32.gmra.mxu0 %v4673_v50 }
 0x182   : > { %1728 = vmatpush.msrb.mxu2 %v1671_v47 }
 0x187   : > { %1374 = vmatmul.f32.gmra.mxu2 %v5725_v2  ;;  %1405 = vmatmul.f32.vlgmr.msrb.gmra.mxu3 %v5726_v3 }
 0x188   : > { %1685 = vmatmul.f32.gmra.mxu1 %v4638_v33  ;;  %1785 = vmatpush.msrb.mxu3 %v4869_v62 }
 0x189   : > { %1614 = vmatmul.f32.gmra.mxu0 %v4692_v59 }
 0x18a   : > { %1787 = vmatpush.msrb.mxu3 %v4876_v26 }
 0x18f   : > { %1409 = vmatmul.f32.gmra.mxu3 %v5727_v39  ;;  %1498 = vmatmul.f32.vlgmr.msra.gmra.mxu2 %v5726_v3 }
 0x190   : > { %1689 = vmatmul.f32.gmra.mxu1 %v4659_v43 }
 0x191   : > { %1622 = vmatmul.f32.gmra.mxu0 %v4711_v4 }
 0x197   : > { %1502 = vmatmul.f32.gmra.mxu2 %v5727_v39  ;;  %1525 = vmatmul.f32.vlgmr.msra.gmra.mxu3 %v5726_v3 }
 0x198   : > { %1693 = vmatmul.f32.gmra.mxu1 %v4678_v52 }
 0x199   : > { %1630 = vmatmul.f32.gmra.mxu0 %v4728_v11 }
 0x19f   : > { %1529 = vmatmul.f32.gmra.mxu3 %v5727_v39  ;;  %1731 = vmatmul.f32.vlgmr.msrb.gmra.mxu2 %v4620_v21 }
 0x1a0   : > { %1697 = vmatmul.f32.gmra.mxu1 %v4697_v61 }
 0x1a1   : > { %1638 = vmatmul.f32.gmra.mxu0 %v5724_v1 }
 0x1a2   : > { %v4942_v40 = vpop.f32.mrf.mxu2 }
 0x1a7   : > { %1736 = vmatmul.f32.gmra.mxu2 %v4623_v24  ;;  %1791 = vmatmul.f32.vlgmr.msrb.gmra.mxu3 %v4628_v27 }
 0x1a8   : > { %1701 = vmatmul.f32.gmra.mxu1 %v5726_v3 }
 0x1a9   : > { %1646 = vmatmul.f32.gmra.mxu0 %v5725_v2 }
 0x1aa   : > { %v4948_v7 = vpop.f32.mrf.mxu2  ;;  %v4950_v10 = vpop.f32.mrf.mxu3 }
 0x1ae   : > { %v4952_v6 = vpop.f32.mrf.mxu0  ;;  %v4958_v22 = vpop.f32.mrf.mxu1 }
 0x1af   : > { %1741 = vmatmul.f32.gmra.mxu2 %v4647_v37  ;;  %1797 = vmatmul.f32.gmra.mxu3 %v4636_v32 }
 0x1b0   : > { %1705 = vmatmul.f32.gmra.mxu1 %v5727_v39 }
 0x1b1   : > { %1860 = vmatmul.f32.vlgmr.msrb.gmra.mxu0 %v4615_v17 }
 0x1b2   : > { %v4960_v28 = vpop.f32.mrf.mxu3  ;;  %v4962_v29 = vpop.f32.mrf.mxu2 }
 0x1b6   : > { %v4964_v30 = vpop.f32.mrf.mxu0  ;;  %v4974_v31 = vpop.f32.mrf.mxu1 }
 0x1b7   : > { %1746 = vmatmul.f32.gmra.mxu2 %v4666_v46  ;;  %1803 = vmatmul.f32.gmra.mxu3 %v4657_v42  ;;  %v819_v42 = vadd.f32 %v4950_v10, %v4942_v40 }
 0x1b8   : > { %1911 = vmatmul.f32.vlgmr.msrb.gmra.mxu1 %v4615_v17 }
 0x1b9   : > { %1864 = vmatmul.f32.gmra.mxu0 %v4617_v20  ;;  %v849_v17 = vadd.f32 %v4962_v29, %v819_v42 }
 0x1ba   : > { %v4970_v19 = vpop.f32.mrf.mxu2  ;;  %v4972_v13 = vpop.f32.mrf.mxu3 }
 0x1be   : > { %v1171_v14 = vpop.f32.mrf.mxu0 }
 0x1bf   : > { %1751 = vmatmul.f32.gmra.mxu2 %v4685_v55  ;;  %1809 = vmatmul.f32.gmra.mxu3 %v4676_v51 }
 0x1c0   : > { %1915 = vmatmul.f32.gmra.mxu1 %v4617_v20 }
 0x1c1   : > { %1868 = vmatmul.f32.gmra.mxu0 %v4638_v33 }
 0x1c2   : > { %v4980_v34 = vpop.f32.mrf.mxu3  ;;  %v4982_v5 = vpop.f32.mrf.mxu2 }
 0x1c5   : > { %v1210_v62 = vpop.f32.mrf.mxu1 }
 0x1c6   : > { %v1179_v23 = vpop.f32.mrf.mxu0  ;;  %v1211_v4 = vadd.f32 %v1210_v62, %v1171_v14 }
 0x1c7   : > { %1756 = vmatmul.f32.gmra.mxu2 %v4704_v0  ;;  %1815 = vmatmul.f32.gmra.mxu3 %v4695_v60 }
 0x1c8   : > { %1919 = vmatmul.f32.gmra.mxu1 %v4638_v33 }
 0x1c9   : > { %1872 = vmatmul.f32.gmra.mxu0 %v4659_v43 }
 0x1ca   : > { %v4988_v44 = vpop.f32.mrf.mxu2  ;;  %v4990_v36 = vpop.f32.mrf.mxu3 }
 0x1cd   : > { %v1214_v26 = vpop.f32.mrf.mxu1 }
 0x1ce   : > { %v4992_v58 = vpop.f32.mrf.mxu0  ;;  %v1215_v21 = vadd.f32 %v1214_v26, %v1179_v23 }
 0x1cf   : > { %1761 = vmatmul.f32.gmra.mxu2 %v4723_v9  ;;  %1821 = vmatmul.f32.gmra.mxu3 %v5723_v63 }
 0x1d0   : > { %1923 = vmatmul.f32.gmra.mxu1 %v4659_v43 }
 0x1d1   : > { %1876 = vmatmul.f32.gmra.mxu0 %v4678_v52 }
 0x1d2   : > { %v4998_v47 = vpop.f32.mrf.mxu3  ;;  %v975_v56 = vpop.f32.mrf.mxu2 }
 0x1d5   : > { %v5000_v48 = vpop.f32.mrf.mxu1 }
 0x1d6   : > { %v5002_v38 = vpop.f32.mrf.mxu0 }
 0x1d7   : > { %1766 = vmatmul.f32.gmra.mxu2 %v4740_v15  ;;  %1827 = vmatmul.f32.gmra.mxu3 %v4731_v12 }
 0x1d8   : > { %1927 = vmatmul.f32.gmra.mxu1 %v4678_v52 }
 0x1d9   : > { %1880 = vmatmul.f32.gmra.mxu0 %v4697_v61 }
 0x1da   : > { %v983_v53 = vpop.f32.mrf.mxu2  ;;  %v1014_v45 = vpop.f32.mrf.mxu3 }
 0x1db   : > { %v1015_v52 = vadd.f32 %v1014_v45, %v975_v56 }
 0x1dd   : > { %v5008_v25 = vpop.f32.mrf.mxu1  ;;  %v1045_v46 = vadd.f32 %v4952_v6, %v1015_v52  ;;  %v823_v52 = vadd.f32 %v4960_v28, %v4948_v7 }
 0x1de   : > { %v1436_v8 = vpop.f32.mrf.mxu0 }
 0x1df   : > { %1833 = vmatmul.f32.gmra.mxu3 %v4747_v18  ;;  %v1075_v62 = vadd.f32 %v4958_v22, %v1045_v46  ;;  %v854_v42 = vadd.f32 %v4970_v19, %v823_v52 }
 0x1e0   : > { %1931 = vmatmul.f32.gmra.mxu1 %v4697_v61 }
 0x1e1   : > { %1884 = vmatmul.f32.gmra.mxu0 %v5726_v3  ;;  %v885_v40 = vadd.f32 %v4980_v34, %v854_v42 }
 0x1e2   : > { %v1018_v49 = vpop.f32.mrf.mxu3  ;;  %v1107_v16 = vpop.f32.mrf.mxu2 }
 0x1e3   : > { %v1019_v27 = vadd.f32 %v1018_v49, %v983_v53  ;;  %v916_v6 = vadd.f32 %v4988_v44, %v885_v40 }
 0x1e5   : > { %v1466_v54 = vpop.f32.mrf.mxu1  ;;  %v1050_v14 = vadd.f32 %v4964_v30, %v1019_v27  ;;  %v943_v19 = vadd.f32 %v4998_v47, %v916_v6 }
 0x1e6   : > { %v5013_v57 = vpop.f32.mrf.mxu0 }
 0x1e8   : > { %1935 = vmatmul.f32.gmra.mxu1 %v5726_v3 }
 0x1e9   : > { %1888 = vmatmul.f32.gmra.mxu0 %v5727_v39 }
 0x1ea   : > { %v1111_v2 = vpop.f32.mrf.mxu2  ;;  %v1134_v1 = vpop.f32.mrf.mxu3 }
 0x1ed   : > { %v5017_v63 = vpop.f32.mrf.mxu1 }
 0x1ee   : > { %v5019_v60 = vpop.f32.mrf.mxu0 }
 0x1f0   : > { %1939 = vmatmul.f32.gmra.mxu1 %v5727_v39 }
 0x1f2   : > { %v1138_v0 = vpop.f32.mrf.mxu3  ;;  %v1240_v18 = vpop.f32.mrf.mxu2 }
 0x1f3   : > { %v1241_v24 = vadd.f32 %v1240_v18, %v1211_v4  ;;  %v1108_v4 = vadd.f32 %v1107_v16, %v1075_v62 }
 0x1f5   : > { %v5022_v55 = vpop.f32.mrf.mxu1 }
 0x1f6   : > { %v5024_v15 = vpop.f32.mrf.mxu0  ;;  %v1679_v42 = vadd.f32 %v5022_v55, %v5019_v60 }
 0x1fa   : > { %v1245_v12 = vpop.f32.mrf.mxu2  ;;  %v1270_v9 = vpop.f32.mrf.mxu3 }
 0x1fb   : > { %v1271_v20 = vadd.f32 %v1270_v9, %v1241_v24  ;;  %v1246_v56 = vadd.f32 %v1245_v12, %v1215_v21  ;;  %v1081_v21 = vadd.f32 %v4974_v31, %v1050_v14 }
 0x1fd   : > { %v5026_v43 = vpop.f32.mrf.mxu1  ;;  %v1304_v18 = vadd.f32 %v4992_v58, %v1271_v20  ;;  %v1112_v7 = vadd.f32 %v1111_v2, %v1081_v21 }
 0x1fe   : > { %v5028_v3 = vpop.f32.mrf.mxu0 }
 0x1ff   : > { %v1331_v20 = vadd.f32 %v5000_v48, %v1304_v18  ;;  %v1139_v30 = vadd.f32 %v1138_v0, %v1112_v7  ;;  %v1683_v7 = vadd.f32 %v5026_v43, %v5024_v15 }
 0x202   : > { %v1276_v33 = vpop.f32.mrf.mxu3  ;;  %v1367_v59 = vpop.f32.mrf.mxu2 }
 0x205   : > { %v5030_v61 = vpop.f32.mrf.mxu1 }
 0x206   : > { %v5032_v50 = vpop.f32.mrf.mxu0 }
 0x20a   : > { %v1375_v11 = vpop.f32.mrf.mxu2  ;;  %v1406_v39 = vpop.f32.mrf.mxu3 }
 0x20b   : > { %v1407_v37 = vadd.f32 %v1406_v39, %v1367_v59  ;;  %v879_v59 = vadd.f32 %v4972_v13, %v849_v17  ;;  %v1277_v39 = vadd.f32 %v1276_v33, %v1246_v56  ;;  %v1536_v13 = vsel %vm348_vm0, %v1331_v20, 0.0 }
 0x20d   : > { %v5034_v32 = vpop.f32.mrf.mxu1  ;;  %v1437_v45 = vadd.f32 %v1436_v8, %v1407_v37  ;;  %v912_v9 = vadd.f32 %v4982_v5, %v879_v59  ;;  %v1135_v37 = vadd.f32 %v1134_v1, %v1108_v4  ;;  %v1308_v33 = vadd.f32 %v5002_v38, %v1277_v39  ;;  %v1547_v8 = vld [vmem:[#allocation7] sm:$0xff] }
 0x20e   : > { %v5036_v51 = vpop.f32.mrf.mxu0  ;;  %v1541_v5 = vsel %vm348_vm0, %v1139_v30, 0.0 }
 0x20f   : > { %v1467_v12 = vadd.f32 %v1466_v54, %v1437_v45  ;;  %v939_v17 = vadd.f32 %v4990_v36, %v912_v9  ;;  %v1534_v29 = vsel %vm348_vm0, %v1135_v37, 0.0  ;;  %v1335_v2 = vadd.f32 %v5008_v25, %v1308_v33 }
 0x210   : > { %v1540_v36 = vsel %vm348_vm0, %v943_v19, 0.0 }
 0x211   : > { %v1533_v1 = vsel %vm348_vm0, %v939_v17, 0.0  ;;  %v1543_v58 = vsel %vm348_vm0, %v1335_v2, 0.0  ;;  %v1542_v47 = vadd.f32 %v1541_v5, %v1540_v36 }
 0x212   : > { %v1410_v41 = vpop.f32.mrf.mxu3  ;;  %v1499_v35 = vpop.f32.mrf.mxu2 }
 0x213   : > { %v1411_v46 = vadd.f32 %v1410_v41, %v1375_v11  ;;  %v1500_v10 = vadd.f32 %v1499_v35, %v1467_v12  ;;  %v1535_v35 = vadd.f32 %v1534_v29, %v1533_v1  ;;  %v1544_v49 = vadd.f32 %v1543_v58, %v1542_v47 }
 0x215   : > { %v5048_v24 = vpop.f32.mrf.mxu1  ;;  %v1442_v41 = vadd.f32 %v5013_v57, %v1411_v46  ;;  %v1537_v44 = vadd.f32 %v1536_v13, %v1535_v35  ;;  %v1687_v13 = vadd.f32 %v5030_v61, %v5028_v3  ;;  %v5728_v61 = vld [vmem:[#allocation26_spill] sm:$0xff] }
 0x216   : > { %v5052_v27 = vpop.f32.mrf.mxu0 }
 0x217   : > { %v1473_v0 = vadd.f32 %v5017_v63, %v1442_v41  ;;  %v1548_v63 = vld [vmem:[#allocation7 + $0x8] sm:$0xff] }
 0x21a   : > { %v1503_v22 = vpop.f32.mrf.mxu2  ;;  %v1526_v28 = vpop.f32.mrf.mxu3 }
 0x21b   : > { %v1527_v11 = vadd.f32 %v1526_v28, %v1500_v10  ;;  %v1504_v26 = vadd.f32 %v1503_v22, %v1473_v0 }
 0x21d   : > { %v5066_v31 = vpop.f32.mrf.mxu1  ;;  %v1538_v23 = vsel %vm348_vm0, %v1527_v11, 0.0 }
 0x21e   : > { %v5068_v34 = vpop.f32.mrf.mxu0  ;;  %v1539_v48 = vadd.f32 %v1538_v23, %v1537_v44  ;;  %v1691_v23 = vadd.f32 %v5034_v32, %v5032_v50 }
 0x220   : > { %v1549_v62 = vmul.f32 %v1547_v8, %v1539_v48 }
 0x222   : > { %v1530_v38 = vpop.f32.mrf.mxu3  ;;  %v1732_v53 = vpop.f32.mrf.mxu2  ;;  %v1551_v59 = vsel %vm348_vm0, %v1549_v62, 0.0 }
 0x223   : > { %v1531_v25 = vadd.f32 %v1530_v38, %v1504_v26  ;;  %v1733_v21 = vadd.f32 %v1732_v53, %v1679_v42  ;;  %v5729_v42 = vld [vmem:[#allocation28_spill] sm:$0xff] }
 0x225   : > { %v1545_v16 = vsel %vm348_vm0, %v1531_v25, 0.0  ;;  %v5076_v54 = vpop.f32.mrf.mxu1 }
 0x226   : > { %v1546_v57 = vadd.f32 %v1545_v16, %v1544_v49  ;;  %v5078_v14 = vpop.f32.mrf.mxu0 }
 0x228   : > { %v1550_v56 = vmul.f32 %v1548_v63, %v1546_v57  ;;  %v1695_v63 = vadd.f32 %v5048_v24, %v5036_v51 }
 0x22a   : > { %v1737_v45 = vpop.f32.mrf.mxu2  ;;  %v1792_v52 = vpop.f32.mrf.mxu3  ;;  %v1552_v4 = vsel %vm348_vm0, %v1550_v56, 0.0 }
 0x22b   : > { %v1553_v18 = vadd.f32 %v1552_v4, %v1551_v59  ;;  %v1793_v37 = vadd.f32 %v1792_v52, %v1733_v21  ;;  %v1738_v10 = vadd.f32 %v1737_v45, %v1683_v7 }
 0x22d   : > { %v5082_v39 = vpop.f32.mrf.mxu1  ;;  %1554 = vadd.xlane.f32.xlu0 %v1553_v18 }
 0x22e   : > { %v1861_v9 = vpop.f32.mrf.mxu0 }
 0x22f   : > { %v1862_v40 = vadd.f32 %v1861_v9, %v1793_v37  ;;  %v5730_v9 = vld [vmem:[#allocation19_spill] sm:$0xff] }
 0x232   : > { %v1798_v46 = vpop.f32.mrf.mxu3  ;;  %v1742_v12 = vpop.f32.mrf.mxu2 }
 0x233   : > { %v1799_v6 = vadd.f32 %v1798_v46, %v1738_v10  ;;  %v1743_v44 = vadd.f32 %v1742_v12, %v1687_v13  ;;  %v1699_v12 = vadd.f32 %v5066_v31, %v5052_v27  ;;  %v5732_v27 = vld [vmem:[#allocation21_spill] sm:$0xff] }
 0x235   : > { %v1912_v17 = vpop.f32.mrf.mxu1 }
 0x236   : > { %v1913_v20 = vadd.f32 %v1912_v17, %v1862_v40  ;;  %v1865_v33 = vpop.f32.mrf.mxu0 }
 0x237   : > { %v1866_v29 = vadd.f32 %v1865_v33, %v1799_v6 }
 0x238   : > { %v1944_v22 = vsel %vm348_vm0, %v1913_v20, 0 }
 0x239   : > { %v5089_v30 = vand.u32 4294901760, %v1944_v22 }
 0x23a   : > { %v1804_v28 = vpop.f32.mrf.mxu3  ;;  %v1747_v55 = vpop.f32.mrf.mxu2 }
 0x23b   : > { %v2005_v2 = vsub.f32 %v1944_v22, %v5089_v30  ;;  %v1748_v47 = vadd.f32 %v1747_v55, %v1691_v23  ;;  %v1805_v48 = vadd.f32 %v1804_v28, %v1743_v44  ;;  %v5731_v22 = vld [vmem:[#allocation20_spill] sm:$0xff]  ;;  %v5733_v28 = vld [vmem:[#allocation29_spill] sm:$0xff]  ;;  %v5734_v55 = vld [vmem:[#allocation27_spill] sm:$0xff] }
 0x23c   : > { %v5736_v23 = vld [vmem:[#allocation23_spill] sm:$0xff] }
 0x23d   : > { %v1916_v60 = vpop.f32.mrf.mxu1  ;;  %v2006_v0 = vand.u32 4294901760, %v2005_v2 }
 0x23e   : > { %v1917_v41 = vadd.f32 %v1916_v60, %v1866_v29  ;;  %v1869_v11 = vpop.f32.mrf.mxu0 }
 0x23f   : > { %v2007_v53 = vsub.f32 %v2005_v2, %v2006_v0  ;;  %v1870_v25 = vadd.f32 %v1869_v11, %v1805_v48 }
 0x240   : > { %v1947_v1 = vsel %vm348_vm0, %v1917_v41, 0 }
 0x241   : > { %v1963_v19 = vand.u32 4294901760, %v1947_v1  ;;  %v2008_v50 = vand.u32 4294901760, %v2007_v53 }
 0x242   : > { %v1810_v43 = vpop.f32.mrf.mxu3  ;;  %v1752_v26 = vpop.f32.mrf.mxu2 }
 0x243   : > { %v1999_v15 = vsub.f32 %v1947_v1, %v1963_v19  ;;  %1964 = vmatpush.xpose.msra.mxu2 %v1963_v19  ;;  %v1811_v8 = vadd.f32 %v1810_v43, %v1748_v47  ;;  %v1753_v56 = vadd.f32 %v1752_v26, %v1695_v63  ;;  %v5737_v26 = vld [vmem:[#allocation31_spill] sm:$0xff] }
 0x245   : > { %v2000_v35 = vand.u32 4294901760, %v1999_v15  ;;  %v1920_v5 = vpop.f32.mrf.mxu1 }
 0x246   : > { %v1873_v36 = vpop.f32.mrf.mxu0  ;;  %v1921_v49 = vadd.f32 %v1920_v5, %v1870_v25 }
 0x247   : > { %1966 = vmatpush.xpose.msra.mxu2 %v5089_v30  ;;  %v2001_v58 = vsub.f32 %v1999_v15, %v2000_v35  ;;  %v1874_v16 = vadd.f32 %v1873_v36, %v1811_v8  ;;  %v1703_v36 = vadd.f32 %v5076_v54, %v5068_v34  ;;  %v1707_v8 = vadd.f32 %v5082_v39, %v5078_v14 }
 0x248   : > { %v2140_v45 = vsel %vm348_vm0, %v1921_v49, 0 }
 0x249   : > { %v2002_v38 = vand.u32 4294901760, %v2001_v58  ;;  %v5107_v21 = vand.u32 4294901760, %v2140_v45  ;;  %v5738_v58 = vld [vmem:[#allocation33_spill] sm:$0xff] }
 0x24a   : > { %1972 = vmatmul.f32.vlgmr.msra.gmra.mxu2 %v5728_v61  ;;  %v1816_v3 = vpop.f32.mrf.mxu3  ;;  %v1757_v59 = vpop.f32.mrf.mxu2 }
 0x24b   : > { %2035 = vmatpush.xpose.msrb.mxu2 %v1999_v15  ;;  %2003 = vmatpush.xpose.msra.mxu3 %v2002_v38  ;;  %v1817_v18 = vadd.f32 %v1816_v3, %v1753_v56  ;;  %v5119_v7 = vsub.f32 %v2140_v45, %v5107_v21  ;;  %v1758_v20 = vadd.f32 %v1757_v59, %v1699_v12  ;;  %v5739_v56 = vld [vmem:[#allocation24_spill] sm:$0xff] }
 0x24c   : > { %v5740_v45 = vld [vmem:[#allocation40_spill] sm:$0xff] }
 0x24d   : > { %v1924_v32 = vpop.f32.mrf.mxu1  ;;  %v2202_v1 = vand.u32 4294901760, %v5119_v7 }
 0x24e   : > { %v1925_v57 = vadd.f32 %v1924_v32, %v1874_v16  ;;  %v1877_v62 = vpop.f32.mrf.mxu0 }
 0x24f   : > { %2038 = vmatpush.xpose.msrb.mxu2 %v2005_v2  ;;  %2009 = vmatpush.xpose.msra.mxu3 %v2008_v50  ;;  %v1878_v37 = vadd.f32 %v1877_v62, %v1817_v18  ;;  %v2203_v5 = vsub.f32 %v5119_v7, %v2202_v1 }
 0x250   : > { %v2143_v52 = vsel %vm348_vm0, %v1925_v57, 0 }
 0x251   : > { %v5103_v4 = vand.u32 4294901760, %v2143_v52  ;;  %v2204_v38 = vand.u32 4294901760, %v2203_v5  ;;  %v5747_v5 = vld [vmem:[#allocation30_spill] sm:$0xff] }
 0x252   : > { %1980 = vmatmul.f32.gmra.mxu2 %v5729_v42  ;;  %2011 = vmatmul.f32.vlgmr.msra.gmra.mxu3 %v5730_v9  ;;  %v1822_v24 = vpop.f32.mrf.mxu3  ;;  %v1762_v31 = vpop.f32.mrf.mxu2 }
 0x253   : > { %2098 = vmatpush.xpose.msra.mxu2 %v2000_v35  ;;  %2065 = vmatpush.xpose.msrb.mxu3 %v1963_v19  ;;  %v5110_v51 = vsub.f32 %v2143_v52, %v5103_v4  ;;  %v1823_v10 = vadd.f32 %v1822_v24, %v1758_v20  ;;  %v1763_v3 = vadd.f32 %v1762_v31, %v1703_v36  ;;  %v5743_v31 = vld [vmem:[#allocation32_spill] sm:$0xff] }
 0x254   : > { %2261 = vmatpush.xpose.msra.mxu1 %v5103_v4 }
 0x255   : > { %v1928_v46 = vpop.f32.mrf.mxu1  ;;  %2231 = vmatpush.xpose.msra.mxu0 %v5110_v51  ;;  %v2196_v33 = vand.u32 4294901760, %v5110_v51 }
 0x256   : > { %v1929_v40 = vadd.f32 %v1928_v46, %v1878_v37  ;;  %v1881_v17 = vpop.f32.mrf.mxu0 }
 0x257   : > { %2102 = vmatpush.xpose.msra.mxu2 %v2006_v0  ;;  %2067 = vmatpush.xpose.msrb.mxu3 %v5089_v30  ;;  %v1882_v29 = vadd.f32 %v1881_v17, %v1823_v10  ;;  %v2197_v11 = vsub.f32 %v5110_v51, %v2196_v33  ;;  %v5735_v0 = vld [vmem:[#allocation22_spill] sm:$0xff]  ;;  %v5742_v17 = vld [vmem:[#allocation44_spill] sm:$0xff]  ;;  %v2760_v10 = vld [vmem:[#allocation8 + $0x20] sm:$0xff] }
 0x258   : > { %2263 = vmatpush.xpose.msra.mxu1 %v5107_v21  ;;  %v2336_v6 = vsel %vm348_vm0, %v1929_v40, 0  ;;  %v5741_v40 = vld [vmem:[#allocation34_spill] sm:$0xff] }
 0x259   : > { %2234 = vmatpush.xpose.msra.mxu0 %v5119_v7  ;;  %v5130_v60 = vand.u32 4294901760, %v2336_v6  ;;  %v2198_v35 = vand.u32 4294901760, %v2197_v11  ;;  %v2761_v7 = vld [vmem:[#allocation8 + $0x28] sm:$0xff] }
 0x25a   : > { %2015 = vmatmul.f32.gmra.mxu3 %v5731_v22  ;;  %2041 = vmatmul.f32.vlgmr.msrb.gmra.mxu2 %v5732_v27  ;;  %v1767_v47 = vpop.f32.mrf.mxu2  ;;  %v5180_v20 = vand.u32 4294901760, %v2761_v7 }
 0x25b   : > { %2127 = vmatpush.xpose.msra.mxu3 %v1963_v19  ;;  %2160 = vmatpush.xpose.msrb.mxu2 %v5103_v4  ;;  %v5137_v15 = vsub.f32 %v2336_v6, %v5130_v60  ;;  %v1768_v54 = vadd.f32 %v1767_v47, %v1707_v8  ;;  %v5187_v6 = vand.u32 4294901760, %v2760_v10  ;;  %v5752_v8 = vld [vmem:[#allocation49_spill] sm:$0xff] }
 0x25c   : > { %2267 = vmatmul.f32.vlgmr.msra.gmra.mxu1 %v5733_v28  ;;  %2237 = vmatmul.f32.vlgmr.msra.gmra.mxu0 %v5734_v55 }
 0x25d   : > { %v1932_v41 = vpop.f32.mrf.mxu1  ;;  %v2398_v25 = vand.u32 4294901760, %v5137_v15 }
 0x25e   : > { %v1933_v19 = vadd.f32 %v1932_v41, %v1882_v29  ;;  %v1885_v2 = vpop.f32.mrf.mxu0 }
 0x25f   : > { %2129 = vmatpush.xpose.msra.mxu3 %v5089_v30  ;;  %v1828_v30 = vpop.f32.mrf.mxu3  ;;  %2162 = vmatpush.xpose.msrb.mxu2 %v5107_v21  ;;  %v2399_v63 = vsub.f32 %v5137_v15, %v2398_v25 }
 0x260   : > { %v2339_v43 = vsel %vm348_vm0, %v1933_v19, 0  ;;  %v1829_v16 = vadd.f32 %v1828_v30, %v1763_v3  ;;  %v5194_v30 = vsub.f32 %v2760_v10, %v5187_v6 }
 0x261   : > { %v5139_v13 = vand.u32 4294901760, %v2339_v43  ;;  %v2400_v59 = vand.u32 4294901760, %v2399_v63 }
 0x262   : > { %2046 = vmatmul.f32.gmra.mxu2 %v5735_v0  ;;  %2071 = vmatmul.f32.vlgmr.msrb.gmra.mxu3 %v5736_v23  ;;  %v1886_v57 = vadd.f32 %v1885_v2, %v1829_v16  ;;  %v2867_v11 = vand.u32 4294901760, %v5194_v30  ;;  %v5745_v2 = vld [vmem:[#allocation36_spill] sm:$0xff] }
 0x263   : > { %v5145_v44 = vsub.f32 %v2339_v43, %v5139_v13  ;;  %2199 = vmatpush.xpose.msrb.mxu3 %v2198_v35  ;;  %2356 = vmatpush.xpose.msrb.mxu0 %v5139_v13  ;;  %v5746_v43 = vld [vmem:[#allocation25_spill] sm:$0xff] }
 0x264   : > { %2242 = vmatmul.f32.gmra.mxu0 %v5737_v26  ;;  %2273 = vmatmul.f32.gmra.mxu1 %v5738_v58 }
 0x265   : > { %v1936_v48 = vpop.f32.mrf.mxu1  ;;  %v2392_v53 = vand.u32 4294901760, %v5145_v44 }
 0x266   : > { %v1889_v32 = vpop.f32.mrf.mxu0  ;;  %v1937_v14 = vadd.f32 %v1936_v48, %v1886_v57  ;;  %v5749_v48 = vld [vmem:[#allocation45_spill] sm:$0xff] }
 0x267   : > { %v1834_v49 = vpop.f32.mrf.mxu3  ;;  %2205 = vmatpush.xpose.msrb.mxu3 %v2204_v38  ;;  %2358 = vmatpush.xpose.msrb.mxu0 %v5130_v60  ;;  %v2393_v34 = vsub.f32 %v5145_v44, %v2392_v53  ;;  %v5750_v38 = vld [vmem:[#allocation47_spill] sm:$0xff]  ;;  %v5755_v57 = vld [vmem:[#allocation41_spill] sm:$0xff] }
 0x268   : > { %v1835_v62 = vadd.f32 %v1834_v49, %v1768_v54  ;;  %v2532_v51 = vsel %vm348_vm0, %v1937_v14, 0  ;;  %v5754_v54 = vld [vmem:[#allocation37_spill] sm:$0xff] }
 0x269   : > { %v2394_v50 = vand.u32 4294901760, %v2393_v34  ;;  %v5169_v46 = vand.u32 4294901760, %v2532_v51  ;;  %v5753_v34 = vld [vmem:[#allocation39_spill] sm:$0xff] }
 0x26a   : > { %2077 = vmatmul.f32.gmra.mxu3 %v5739_v56  ;;  %2104 = vmatmul.f32.vlgmr.msra.gmra.mxu2 %v5730_v9  ;;  %v1890_v39 = vadd.f32 %v1889_v32, %v1835_v62  ;;  %v5756_v62 = vld [vmem:[#allocation48_spill] sm:$0xff] }
 0x26b   : > { %2490 = vmatpush.xpose.msra.mxu0 %v2392_v53  ;;  %2294 = vmatpush.xpose.msra.mxu2 %v2196_v33  ;;  %v2593_v33 = vsub.f32 %v2532_v51, %v5169_v46 }
 0x26c   : > { %2395 = vmatpush.xpose.msrb.mxu1 %v2394_v50  ;;  %2364 = vmatmul.f32.vlgmr.msrb.gmra.mxu0 %v5740_v45 }
 0x26d   : > { %v1940_v52 = vpop.f32.mrf.mxu1  ;;  %v2594_v36 = vand.u32 4294901760, %v2593_v33 }
 0x26e   : > { %v1941_v18 = vadd.f32 %v1940_v52, %v1890_v39  ;;  %v5757_v39 = vld [vmem:[#allocation50_spill] sm:$0xff] }
 0x26f   : > { %2494 = vmatpush.xpose.msra.mxu0 %v2398_v25  ;;  %2298 = vmatpush.xpose.msra.mxu2 %v2202_v1  ;;  %v2868_v1 = vsub.f32 %v5194_v30, %v2867_v11  ;;  %v2595_v47 = vsub.f32 %v2593_v33, %v2594_v36  ;;  %v5751_v25 = vld [vmem:[#allocation35_spill] sm:$0xff]  ;;  %v5758_v52 = vld [vmem:[#allocation42_spill] sm:$0xff] }
 0x270   : > { %2401 = vmatpush.xpose.msrb.mxu1 %v2400_v59  ;;  %v2535_v24 = vsel %vm348_vm0, %v1941_v18, 0  ;;  %v5759_v59 = vld [vmem:[#allocation46_spill] sm:$0xff] }
 0x271   : > { %v5165_v37 = vand.u32 4294901760, %v2535_v24  ;;  %v2869_v35 = vand.u32 4294901760, %v2868_v1  ;;  %v2596_v53 = vand.u32 4294901760, %v2595_v47 }
 0x272   : > { %2108 = vmatmul.f32.gmra.mxu2 %v5731_v22  ;;  %2131 = vmatmul.f32.vlgmr.msra.gmra.mxu3 %v5730_v9 }
 0x273   : > { %v5172_v12 = vsub.f32 %v2535_v24, %v5165_v37  ;;  %2323 = vmatpush.xpose.msra.mxu3 %v5103_v4  ;;  %2403 = vmatmul.f32.vlgmr.msrb.gmra.mxu1 %v5741_v40  ;;  %v5185_v4 = vsub.f32 %v2761_v7, %v5180_v20 }
 0x274   : > { %2519 = vmatpush.xpose.msra.mxu1 %v5139_v13  ;;  %2372 = vmatmul.f32.gmra.mxu0 %v5742_v17 }
 0x275   : > { %2623 = vmatpush.xpose.msrb.mxu0 %v5172_v12  ;;  %v2861_v29 = vand.u32 4294901760, %v5185_v4 }
 0x277   : > { %2325 = vmatpush.xpose.msra.mxu3 %v5107_v21  ;;  %v5744_v21 = vld [vmem:[#allocation38_spill] sm:$0xff]  ;;  %v2862_v41 = vsub.f32 %v5185_v4, %v2861_v29 }
 0x278   : > { %2521 = vmatpush.xpose.msra.mxu1 %v5130_v60 }
 0x279   : > { %2626 = vmatpush.xpose.msrb.mxu0 %v2593_v33  ;;  %v2863_v19 = vand.u32 4294901760, %v2862_v41 }
 0x27a   : > { %2135 = vmatmul.f32.gmra.mxu3 %v5731_v22  ;;  %2168 = vmatmul.f32.vlgmr.msrb.gmra.mxu2 %v5743_v31 }
 0x27b   : > { %2407 = vmatmul.f32.gmra.mxu1 %v5744_v21  ;;  %2427 = vmatpush.xpose.msrb.mxu2 %v5145_v44  ;;  %v5748_v44 = vld [vmem:[#allocation43_spill] sm:$0xff] }
 0x27c   : > { %2653 = vmatpush.xpose.msrb.mxu1 %v5165_v37  ;;  %2496 = vmatmul.f32.vlgmr.msra.gmra.mxu0 %v5741_v40 }
 0x27d   : > { %2777 = vmatpush.msra.mxu0 %v5180_v20 }
 0x27f   : > { %2430 = vmatpush.xpose.msrb.mxu2 %v5137_v15  ;;  %2779 = vmatpush.msra.mxu0 %v5187_v6  ;;  %v2588_v15 = vand.u32 4294901760, %v5172_v12 }
 0x280   : > { %2655 = vmatpush.xpose.msrb.mxu1 %v5169_v46 }
 0x282   : > { %2176 = vmatmul.f32.gmra.mxu2 %v5745_v2  ;;  %2207 = vmatmul.f32.vlgmr.msrb.gmra.mxu3 %v5746_v43 }
 0x283   : > { %2457 = vmatpush.xpose.msrb.mxu3 %v5139_v13  ;;  %2523 = vmatmul.f32.vlgmr.msra.gmra.mxu1 %v5741_v40  ;;  %v2589_v13 = vsub.f32 %v5172_v12, %v2588_v15 }
 0x284   : > { %2500 = vmatmul.f32.gmra.mxu0 %v5744_v21  ;;  %2864 = vmatpush.msra.mxu1 %v2863_v19 }
 0x286   : > { %2870 = vmatpush.msra.mxu1 %v2869_v35 }
 0x287   : > { %2459 = vmatpush.xpose.msrb.mxu3 %v5130_v60  ;;  %v2590_v60 = vand.u32 4294901760, %v2589_v13 }
 0x28a   : > { %2211 = vmatmul.f32.gmra.mxu3 %v5747_v5  ;;  %2300 = vmatmul.f32.vlgmr.msra.gmra.mxu2 %v5746_v43 }
 0x28b   : > { %2527 = vmatmul.f32.gmra.mxu1 %v5744_v21  ;;  %2552 = vmatpush.xpose.msra.mxu2 %v5165_v37 }
 0x28c   : > { %2629 = vmatmul.f32.vlgmr.msrb.gmra.mxu0 %v5748_v44 }
 0x28d   : > { %3049 = vmatpush.msrb.mxu0 %v2861_v29 }
 0x28f   : > { %2554 = vmatpush.xpose.msra.mxu2 %v5169_v46  ;;  %3053 = vmatpush.msrb.mxu0 %v2867_v11 }
 0x292   : > { %2304 = vmatmul.f32.gmra.mxu2 %v5747_v5  ;;  %2327 = vmatmul.f32.vlgmr.msra.gmra.mxu3 %v5746_v43 }
 0x293   : > { %2591 = vmatpush.xpose.msra.mxu3 %v2590_v60  ;;  %2659 = vmatmul.f32.vlgmr.msrb.gmra.mxu1 %v5749_v48 }
 0x294   : > { %2634 = vmatmul.f32.gmra.mxu0 %v5750_v38  ;;  %3102 = vmatpush.msrb.mxu1 %v5180_v20 }
 0x296   : > { %3104 = vmatpush.msrb.mxu1 %v5187_v6 }
 0x297   : > { %2597 = vmatpush.xpose.msra.mxu3 %v2596_v53 }
 0x29a   : > { %2331 = vmatmul.f32.gmra.mxu3 %v5747_v5  ;;  %2433 = vmatmul.f32.vlgmr.msrb.gmra.mxu2 %v5751_v25 }
 0x29b   : > { %2665 = vmatmul.f32.gmra.mxu1 %v5752_v8  ;;  %2686 = vmatpush.xpose.msrb.mxu2 %v2588_v15 }
 0x29c   : > { %2785 = vmatmul.f32.vlgmr.msra.gmra.mxu0 %v5728_v61 }
 0x29f   : > { %2690 = vmatpush.xpose.msrb.mxu2 %v2594_v36 }
 0x2a0   : > { %v1555_v3 = vpop.xlane.xlu0 %1554 }
 0x2a1   : > { %v1556_v49 = vrot.slane %v1555_v3, 4 }
 0x2a2   : > { %2438 = vmatmul.f32.gmra.mxu2 %v5753_v34  ;;  %2463 = vmatmul.f32.vlgmr.msrb.gmra.mxu3 %v5754_v54 }
 0x2a3   : > { %v1557_v16 = vadd.f32 %v1556_v49, %v1555_v3  ;;  %2715 = vmatpush.xpose.msrb.mxu3 %v5165_v37  ;;  %2872 = vmatmul.f32.vlgmr.msra.gmra.mxu1 %v5730_v9 }
 0x2a4   : > { %2793 = vmatmul.f32.gmra.mxu0 %v5729_v42 }
 0x2a5   : > { %v1558_v32 = vrot.slane %v1557_v16, 2 }
 0x2a7   : > { %2717 = vmatpush.xpose.msrb.mxu3 %v5169_v46  ;;  %v1559_v50 = vadd.f32 %v1558_v32, %v1557_v16 }
 0x2a9   : > { %v1560_v63 = vrot.slane %v1559_v50, 1 }
 0x2aa   : > { %2469 = vmatmul.f32.gmra.mxu3 %v5755_v57  ;;  %2560 = vmatmul.f32.vlgmr.msra.gmra.mxu2 %v5756_v62 }
 0x2ab   : > { %2876 = vmatmul.f32.gmra.mxu1 %v5731_v22  ;;  %v1561_v14 = vadd.f32 %v1560_v63, %v1559_v50  ;;  %2920 = vmatpush.msra.mxu2 %v5185_v4 }
 0x2ac   : > { %2801 = vmatmul.f32.gmra.mxu0 %v5743_v31 }
 0x2ad   : > { %4124 = vpush %v1561_v14  ;;  %2923 = vmatpush.msra.mxu2 %v5194_v30 }
 0x2b2   : > { %2568 = vmatmul.f32.gmra.mxu2 %v5757_v39  ;;  %2599 = vmatmul.f32.vlgmr.msra.gmra.mxu3 %v5758_v52 }
 0x2b3   : > { %2880 = vmatmul.f32.gmra.mxu1 %v5746_v43  ;;  %2980 = vmatpush.msra.mxu3 %v5180_v20 }
 0x2b4   : > { %2809 = vmatmul.f32.gmra.mxu0 %v5745_v2 }
 0x2b5   : > { %2982 = vmatpush.msra.mxu3 %v5187_v6 }
 0x2ba   : > { %2603 = vmatmul.f32.gmra.mxu3 %v5759_v59  ;;  %2692 = vmatmul.f32.vlgmr.msrb.gmra.mxu2 %v5758_v52 }
 0x2bb   : > { %2884 = vmatmul.f32.gmra.mxu1 %v5747_v5 }
 0x2bc   : > { %2817 = vmatmul.f32.gmra.mxu0 %v5740_v45 }
 0x2c2   : > { %2696 = vmatmul.f32.gmra.mxu2 %v5759_v59  ;;  %2719 = vmatmul.f32.vlgmr.msrb.gmra.mxu3 %v5758_v52 }
 0x2c3   : > { %2888 = vmatmul.f32.gmra.mxu1 %v5741_v40 }
 0x2c4   : > { %2825 = vmatmul.f32.gmra.mxu0 %v5742_v17 }
 0x2ca   : > { %2723 = vmatmul.f32.gmra.mxu3 %v5759_v59  ;;  %2926 = vmatmul.f32.vlgmr.msra.gmra.mxu2 %v5732_v27 }
 0x2cb   : > { %2892 = vmatmul.f32.gmra.mxu1 %v5744_v21 }
 0x2cc   : > { %2833 = vmatmul.f32.gmra.mxu0 %v5756_v62 }
 0x2cd   : > { %v5259_v18 = vpop.f32.mrf.mxu2 }
 0x2d2   : > { %2931 = vmatmul.f32.gmra.mxu2 %v5735_v0  ;;  %2986 = vmatmul.f32.vlgmr.msra.gmra.mxu3 %v5736_v23 }
 0x2d3   : > { %2896 = vmatmul.f32.gmra.mxu1 %v5758_v52 }
 0x2d4   : > { %2841 = vmatmul.f32.gmra.mxu0 %v5757_v39 }
 0x2d5   : > { %v5265_v51 = vpop.f32.mrf.mxu2  ;;  %v5267_v24 = vpop.f32.mrf.mxu3 }
 0x2d9   : > { %v5269_v37 = vpop.f32.mrf.mxu0  ;;  %v5275_v46 = vpop.f32.mrf.mxu1 }
 0x2da   : > { %2936 = vmatmul.f32.gmra.mxu2 %v5734_v55  ;;  %2992 = vmatmul.f32.gmra.mxu3 %v5739_v56 }
 0x2db   : > { %2900 = vmatmul.f32.gmra.mxu1 %v5759_v59 }
 0x2dc   : > { %3055 = vmatmul.f32.vlgmr.msrb.gmra.mxu0 %v5730_v9 }
 0x2dd   : > { %v5277_v12 = vpop.f32.mrf.mxu3  ;;  %v5279_v7 = vpop.f32.mrf.mxu2 }
 0x2de   : > { %s4125_s23 = spop %4124 }
 0x2e1   : > { %v5281_v20 = vpop.f32.mrf.mxu0  ;;  %v5291_v4 = vpop.f32.mrf.mxu1 }
 0x2e2   : > { %2941 = vmatmul.f32.gmra.mxu2 %v5737_v26  ;;  %2998 = vmatmul.f32.gmra.mxu3 %v5733_v28  ;;  %v2013_v28 = vadd.f32 %v5267_v24, %v5259_v18 }
 0x2e3   : > { %3106 = vmatmul.f32.vlgmr.msrb.gmra.mxu1 %v5730_v9 }
 0x2e4   : > { %3059 = vmatmul.f32.gmra.mxu0 %v5731_v22  ;;  %v2043_v27 = vadd.f32 %v5279_v7, %v2013_v28 }
 0x2e5   : > { %v5287_v33 = vpop.f32.mrf.mxu2  ;;  %v5289_v10 = vpop.f32.mrf.mxu3 }
 0x2e9   : > { %v5293_v6 = vpop.f32.mrf.mxu0 }
 0x2ea   : > { %2946 = vmatmul.f32.gmra.mxu2 %v5751_v25  ;;  %3004 = vmatmul.f32.gmra.mxu3 %v5738_v58 }
 0x2eb   : > { %3110 = vmatmul.f32.gmra.mxu1 %v5731_v22 }
 0x2ec   : > { %3063 = vmatmul.f32.gmra.mxu0 %v5746_v43 }
 0x2ed   : > { %v5299_v29 = vpop.f32.mrf.mxu3  ;;  %v5301_v30 = vpop.f32.mrf.mxu2 }
 0x2f0   : > { %v2404_v41 = vpop.f32.mrf.mxu1 }
 0x2f1   : > { %v5303_v11 = vpop.f32.mrf.mxu0 }
 0x2f2   : > { %2951 = vmatmul.f32.gmra.mxu2 %v5753_v34  ;;  %3010 = vmatmul.f32.gmra.mxu3 %v5754_v54 }
 0x2f3   : > { %3114 = vmatmul.f32.gmra.mxu1 %v5746_v43 }
 0x2f4   : > { %3067 = vmatmul.f32.gmra.mxu0 %v5747_v5 }
 0x2f5   : > { %v5309_v1 = vpop.f32.mrf.mxu2  ;;  %v5311_v19 = vpop.f32.mrf.mxu3 }
 0x2f8   : > { %v2408_v35 = vpop.f32.mrf.mxu1 }
 0x2f9   : > { %v5313_v15 = vpop.f32.mrf.mxu0 }
 0x2fa   : > { %2956 = vmatmul.f32.gmra.mxu2 %v5748_v44  ;;  %3016 = vmatmul.f32.gmra.mxu3 %v5755_v57 }
 0x2fb   : > { %3118 = vmatmul.f32.gmra.mxu1 %v5747_v5 }
 0x2fc   : > { %3071 = vmatmul.f32.gmra.mxu0 %v5741_v40 }
 0x2fd   : > { %v5319_v13 = vpop.f32.mrf.mxu3  ;;  %v2169_v36 = vpop.f32.mrf.mxu2 }
 0x300   : > { %v5321_v60 = vpop.f32.mrf.mxu1 }
 0x301   : > { %v5323_v47 = vpop.f32.mrf.mxu0 }
 0x302   : > { %2961 = vmatmul.f32.gmra.mxu2 %v5750_v38  ;;  %3022 = vmatmul.f32.gmra.mxu3 %v5749_v48 }
 0x303   : > { %3122 = vmatmul.f32.gmra.mxu1 %v5741_v40 }
 0x304   : > { %3075 = vmatmul.f32.gmra.mxu0 %v5744_v21 }
 0x305   : > { %v2177_v53 = vpop.f32.mrf.mxu2  ;;  %v2208_v3 = vpop.f32.mrf.mxu3 }
 0x306   : > { %v2209_v56 = vadd.f32 %v2208_v3, %v2169_v36 }
 0x308   : > { %v5329_v49 = vpop.f32.mrf.mxu1  ;;  %v2239_v26 = vadd.f32 %v5269_v37, %v2209_v56  ;;  %v2017_v56 = vadd.f32 %v5277_v12, %v5265_v51 }
 0x309   : > { %v2630_v16 = vpop.f32.mrf.mxu0 }
 0x30a   : > { %3028 = vmatmul.f32.gmra.mxu3 %v5752_v8  ;;  %v2048_v28 = vadd.f32 %v5287_v33, %v2017_v56 }
 0x30b   : > { %3126 = vmatmul.f32.gmra.mxu1 %v5744_v21 }
 0x30c   : > { %3079 = vmatmul.f32.gmra.mxu0 %v5758_v52 }
 0x30d   : > { %v2212_v32 = vpop.f32.mrf.mxu3  ;;  %v2301_v50 = vpop.f32.mrf.mxu2 }
 0x30e   : > { %v2213_v23 = vadd.f32 %v2212_v32, %v2177_v53 }
 0x310   : > { %v2660_v63 = vpop.f32.mrf.mxu1 }
 0x311   : > { %v5334_v14 = vpop.f32.mrf.mxu0 }
 0x313   : > { %3130 = vmatmul.f32.gmra.mxu1 %v5758_v52 }
 0x314   : > { %3083 = vmatmul.f32.gmra.mxu0 %v5759_v59 }
 0x315   : > { %v2305_v39 = vpop.f32.mrf.mxu2  ;;  %v2328_v62 = vpop.f32.mrf.mxu3 }
 0x318   : > { %v5338_v57 = vpop.f32.mrf.mxu1 }
 0x319   : > { %v2786_v34 = vpop.f32.mrf.mxu0 }
 0x31b   : > { %3134 = vmatmul.f32.gmra.mxu1 %v5759_v59 }
 0x31d   : > { %v2332_v54 = vpop.f32.mrf.mxu3  ;;  %v2434_v8 = vpop.f32.mrf.mxu2 }
 0x320   : > { %v2873_v25 = vpop.f32.mrf.mxu1 }
 0x321   : > { %v5341_v38 = vadd.f32 %v2873_v25, %v2786_v34  ;;  %v5343_v48 = vpop.f32.mrf.mxu0  ;;  %v2405_v25 = vadd.f32 %v2404_v41, %v5293_v6  ;;  %v2244_v6 = vadd.f32 %v5281_v20, %v2213_v23  ;;  %v2269_v41 = vadd.f32 %v5275_v46, %v2239_v26 }
 0x323   : > { %v2435_v0 = vadd.f32 %v2434_v8, %v2405_v25 }
 0x325   : > { %v2439_v44 = vpop.f32.mrf.mxu2  ;;  %v2464_v5 = vpop.f32.mrf.mxu3 }
 0x328   : > { %v5345_v43 = vpop.f32.mrf.mxu1 }
 0x329   : > { %v2802_v52 = vpop.f32.mrf.mxu0 }
 0x32d   : > { %v2470_v2 = vpop.f32.mrf.mxu3  ;;  %v2561_v21 = vpop.f32.mrf.mxu2 }
 0x330   : > { %v2881_v31 = vpop.f32.mrf.mxu1 }
 0x331   : > { %v5347_v17 = vadd.f32 %v2881_v31, %v2802_v52  ;;  %v5349_v40 = vpop.f32.mrf.mxu0  ;;  %v2409_v31 = vadd.f32 %v2408_v35, %v5303_v11  ;;  %v2465_v52 = vadd.f32 %v2464_v5, %v2435_v0 }
 0x333   : > { %v2440_v3 = vadd.f32 %v2439_v44, %v2409_v31  ;;  %v2498_v8 = vadd.f32 %v5313_v15, %v2465_v52  ;;  %v2743_v52 = vld [vmem:[#allocation7 + $0x18] sm:$0xff] }
 0x335   : > { %v2569_v59 = vpop.f32.mrf.mxu2  ;;  %v2600_v45 = vpop.f32.mrf.mxu3  ;;  %v2471_v18 = vadd.f32 %v2470_v2, %v2440_v3  ;;  %v2525_v2 = vadd.f32 %v5321_v60, %v2498_v8 }
 0x336   : > { %v2601_v55 = vadd.f32 %v2600_v45, %v2561_v21  ;;  %v2073_v45 = vadd.f32 %v5289_v10, %v2043_v27  ;;  %v2302_v21 = vadd.f32 %v2301_v50, %v2269_v41  ;;  %v2079_v27 = vadd.f32 %v5299_v29, %v2048_v28 }
 0x337   : > { %v2502_v12 = vadd.f32 %v5323_v47, %v2471_v18  ;;  %v2730_v29 = vsel %vm348_vm0, %v2525_v2, 0.0 }
 0x338   : > { %v5352_v34 = vpop.f32.mrf.mxu1  ;;  %v2631_v9 = vadd.f32 %v2630_v16, %v2601_v55  ;;  %v2106_v5 = vadd.f32 %v5301_v30, %v2073_v45  ;;  %v2275_v55 = vadd.f32 %v5291_v4, %v2244_v6  ;;  %v2329_v26 = vadd.f32 %v2328_v62, %v2302_v21 }
 0x339   : > { %v2818_v58 = vpop.f32.mrf.mxu0 }
 0x33a   : > { %v2661_v51 = vadd.f32 %v2660_v63, %v2631_v9  ;;  %v2133_v37 = vadd.f32 %v5311_v19, %v2106_v5  ;;  %v2306_v46 = vadd.f32 %v2305_v39, %v2275_v55  ;;  %v2728_v10 = vsel %vm348_vm0, %v2329_v26, 0.0  ;;  %v2742_v63 = vld [vmem:[#allocation7 + $0x10] sm:$0xff] }
 0x33b   : > { %v2529_v39 = vadd.f32 %v5329_v49, %v2502_v12 }
 0x33c   : > { %v2333_v4 = vadd.f32 %v2332_v54, %v2306_v46  ;;  %v2727_v62 = vsel %vm348_vm0, %v2133_v37, 0.0  ;;  %v2878_v37 = vadd.f32 %v5345_v43, %v5343_v48 }
 0x33d   : > { %v2604_v22 = vpop.f32.mrf.mxu3  ;;  %v2693_v36 = vpop.f32.mrf.mxu2  ;;  %v2729_v11 = vadd.f32 %v2728_v10, %v2727_v62 }
 0x33e   : > { %v2605_v44 = vadd.f32 %v2604_v22, %v2569_v59  ;;  %v2694_v7 = vadd.f32 %v2693_v36, %v2661_v51  ;;  %v2735_v19 = vsel %vm348_vm0, %v2333_v4, 0.0 }
 0x33f   : > { %v2731_v15 = vadd.f32 %v2730_v29, %v2729_v11 }
 0x340   : > { %v2889_v0 = vpop.f32.mrf.mxu1  ;;  %v2636_v22 = vadd.f32 %v5334_v14, %v2605_v44 }
 0x341   : > { %v5367_v24 = vadd.f32 %v2889_v0, %v2818_v58  ;;  %v5369_v23 = vpop.f32.mrf.mxu0  ;;  %v2110_v58 = vadd.f32 %v5309_v1, %v2079_v27 }
 0x342   : > { %v2667_v35 = vadd.f32 %v5338_v57, %v2636_v22 }
 0x343   : > { %v2137_v59 = vadd.f32 %v5319_v13, %v2110_v58  ;;  %v2737_v13 = vsel %vm348_vm0, %v2529_v39, 0.0 }
 0x345   : > { %v2697_v20 = vpop.f32.mrf.mxu2  ;;  %v2720_v33 = vpop.f32.mrf.mxu3  ;;  %v2734_v60 = vsel %vm348_vm0, %v2137_v59, 0.0 }
 0x346   : > { %v2721_v9 = vadd.f32 %v2720_v33, %v2694_v7  ;;  %v2698_v47 = vadd.f32 %v2697_v20, %v2667_v35  ;;  %v2736_v53 = vadd.f32 %v2735_v19, %v2734_v60  ;;  %v2886_v19 = vadd.f32 %v5352_v34, %v5349_v40 }
 0x348   : > { %v5383_v30 = vpop.f32.mrf.mxu1  ;;  %v2732_v54 = vsel %vm348_vm0, %v2721_v9, 0.0  ;;  %v2738_v14 = vadd.f32 %v2737_v13, %v2736_v53 }
 0x349   : > { %v2834_v1 = vpop.f32.mrf.mxu0  ;;  %v2733_v49 = vadd.f32 %v2732_v54, %v2731_v15 }
 0x34b   : > { %v2744_v41 = vmul.f32 %v2742_v63, %v2733_v49 }
 0x34d   : > { %v2724_v16 = vpop.f32.mrf.mxu3  ;;  %v2927_v32 = vpop.f32.mrf.mxu2  ;;  %v2746_v21 = vsel %vm348_vm0, %v2744_v41, 0.0 }
 0x34e   : > { %v2725_v50 = vadd.f32 %v2724_v16, %v2698_v47  ;;  %v2928_v5 = vadd.f32 %v2927_v32, %v5341_v38 }
 0x350   : > { %v2739_v25 = vsel %vm348_vm0, %v2725_v50, 0.0  ;;  %v2897_v31 = vpop.f32.mrf.mxu1 }
 0x351   : > { %v2740_v57 = vadd.f32 %v2739_v25, %v2738_v14  ;;  %v5391_v36 = vadd.f32 %v2897_v31, %v2834_v1  ;;  %v5393_v6 = vpop.f32.mrf.mxu0 }
 0x353   : > { %v2745_v3 = vmul.f32 %v2743_v52, %v2740_v57 }
 0x355   : > { %v2932_v56 = vpop.f32.mrf.mxu2  ;;  %v2987_v45 = vpop.f32.mrf.mxu3  ;;  %v2747_v8 = vsel %vm348_vm0, %v2745_v3, 0.0 }
 0x356   : > { %v2748_v18 = vadd.f32 %v2747_v8, %v2746_v21  ;;  %v2988_v55 = vadd.f32 %v2987_v45, %v2928_v5  ;;  %v2933_v12 = vadd.f32 %v2932_v56, %v2878_v37  ;;  %v5760_v56 = vld [vmem:[#allocation19_spill] sm:$0xff]  ;;  %v5761_v37 = vld [vmem:[#allocation20_spill] sm:$0xff] }
 0x358   : > { %v5397_v0 = vpop.f32.mrf.mxu1  ;;  %2749 = vadd.xlane.f32.xlu0 %v2748_v18 }
 0x359   : > { %v3056_v28 = vpop.f32.mrf.mxu0 }
 0x35a   : > { %v3057_v51 = vadd.f32 %v3056_v28, %v2988_v55 }
 0x35d   : > { %v2993_v26 = vpop.f32.mrf.mxu3  ;;  %v2937_v44 = vpop.f32.mrf.mxu2 }
 0x35e   : > { %v2994_v7 = vadd.f32 %v2993_v26, %v2933_v12  ;;  %v2938_v35 = vadd.f32 %v2937_v44, %v5347_v17  ;;  %v5764_v12 = vld [vmem:[#allocation27_spill] sm:$0xff] }
 0x360   : > { %v3107_v27 = vpop.f32.mrf.mxu1 }
 0x361   : > { %v3108_v46 = vadd.f32 %v3107_v27, %v3057_v51  ;;  %v3060_v2 = vpop.f32.mrf.mxu0 }
 0x362   : > { %v3061_v33 = vadd.f32 %v3060_v2, %v2994_v7 }
 0x363   : > { %v3139_v58 = vsel %vm348_vm0, %v3108_v46, 0  ;;  %v5763_v46 = vld [vmem:[#allocation29_spill] sm:$0xff] }
 0x364   : > { %v5403_v10 = vand.u32 4294901760, %v3139_v58 }
 0x365   : > { %v2999_v20 = vpop.f32.mrf.mxu3  ;;  %v2942_v4 = vpop.f32.mrf.mxu2 }
 0x366   : > { %v3200_v59 = vsub.f32 %v3139_v58, %v5403_v10  ;;  %v2943_v47 = vadd.f32 %v2942_v4, %v2886_v19  ;;  %v3000_v13 = vadd.f32 %v2999_v20, %v2938_v35 }
 0x368   : > { %v3111_v38 = vpop.f32.mrf.mxu1  ;;  %v3201_v1 = vand.u32 4294901760, %v3200_v59 }
 0x369   : > { %v3112_v22 = vadd.f32 %v3111_v38, %v3061_v33  ;;  %v3064_v9 = vpop.f32.mrf.mxu0 }
 0x36a   : > { %v3202_v49 = vsub.f32 %v3200_v59, %v3201_v1  ;;  %v3065_v16 = vadd.f32 %v3064_v9, %v3000_v13 }
 0x36b   : > { %v3142_v62 = vsel %vm348_vm0, %v3112_v22, 0 }
 0x36c   : > { %v3158_v39 = vand.u32 4294901760, %v3142_v62  ;;  %v3203_v34 = vand.u32 4294901760, %v3202_v49 }
 0x36d   : > { %v3005_v43 = vpop.f32.mrf.mxu3  ;;  %v2947_v15 = vpop.f32.mrf.mxu2 }
 0x36e   : > { %v3194_v48 = vsub.f32 %v3142_v62, %v3158_v39  ;;  %3159 = vmatpush.xpose.msrb.mxu2 %v3158_v39  ;;  %v3006_v32 = vadd.f32 %v3005_v43, %v2943_v47  ;;  %v2948_v31 = vadd.f32 %v2947_v15, %v5367_v24  ;;  %v5765_v43 = vld [vmem:[#allocation22_spill] sm:$0xff]  ;;  %v2902_v47 = vadd.f32 %v5397_v0, %v5393_v6 }
 0x370   : > { %v3195_v29 = vand.u32 4294901760, %v3194_v48  ;;  %v3115_v11 = vpop.f32.mrf.mxu1 }
 0x371   : > { %v3068_v54 = vpop.f32.mrf.mxu0  ;;  %v3116_v63 = vadd.f32 %v3115_v11, %v3065_v16  ;;  %v5767_v11 = vld [vmem:[#allocation31_spill] sm:$0xff] }
 0x372   : > { %3161 = vmatpush.xpose.msrb.mxu2 %v5403_v10  ;;  %v3196_v60 = vsub.f32 %v3194_v48, %v3195_v29  ;;  %v3069_v40 = vadd.f32 %v3068_v54, %v3006_v32 }
 0x373   : > { %v3335_v52 = vsel %vm348_vm0, %v3116_v63, 0 }
 0x374   : > { %v3197_v53 = vand.u32 4294901760, %v3196_v60  ;;  %v5419_v45 = vand.u32 4294901760, %v3335_v52 }
 0x375   : > { %3167 = vmatmul.f32.vlgmr.msrb.gmra.mxu2 %v5728_v61  ;;  %v3011_v50 = vpop.f32.mrf.mxu3  ;;  %v2952_v41 = vpop.f32.mrf.mxu2 }
 0x376   : > { %3230 = vmatpush.xpose.msra.mxu2 %v3194_v48  ;;  %3198 = vmatpush.xpose.msrb.mxu3 %v3197_v53  ;;  %v3012_v3 = vadd.f32 %v3011_v50, %v2948_v31  ;;  %v5430_v55 = vsub.f32 %v3335_v52, %v5419_v45  ;;  %v5766_v48 = vld [vmem:[#allocation23_spill] sm:$0xff]  ;;  %v5770_v31 = vld [vmem:[#allocation40_spill] sm:$0xff] }
 0x378   : > { %v3119_v17 = vpop.f32.mrf.mxu1 }
 0x379   : > { %v3120_v14 = vadd.f32 %v3119_v17, %v3069_v40  ;;  %v3072_v25 = vpop.f32.mrf.mxu0 }
 0x37a   : > { %3233 = vmatpush.xpose.msra.mxu2 %v3200_v59  ;;  %3204 = vmatpush.xpose.msrb.mxu3 %v3203_v34  ;;  %v3073_v8 = vadd.f32 %v3072_v25, %v3012_v3 }
 0x37b   : > { %v3338_v57 = vsel %vm348_vm0, %v3120_v14, 0  ;;  %v5769_v14 = vld [vmem:[#allocation24_spill] sm:$0xff] }
 0x37c   : > { %v5415_v61 = vand.u32 4294901760, %v3338_v57 }
 0x37d   : > { %3175 = vmatmul.f32.gmra.mxu2 %v5729_v42  ;;  %3206 = vmatmul.f32.vlgmr.msrb.gmra.mxu3 %v5760_v56  ;;  %v3017_v24 = vpop.f32.mrf.mxu3  ;;  %v2894_v42 = vadd.f32 %v5383_v30, %v5369_v23  ;;  %v5762_v23 = vld [vmem:[#allocation21_spill] sm:$0xff]  ;;  %v2957_v30 = vpop.f32.mrf.mxu2 }
 0x37e   : > { %3293 = vmatpush.xpose.msrb.mxu2 %v3195_v29  ;;  %3260 = vmatpush.xpose.msra.mxu3 %v3158_v39  ;;  %v5422_v21 = vsub.f32 %v3338_v57, %v5415_v61  ;;  %v2958_v13 = vadd.f32 %v2957_v30, %v5391_v36 }
 0x37f   : > { %3456 = vmatpush.xpose.msra.mxu1 %v5415_v61  ;;  %v2953_v26 = vadd.f32 %v2952_v41, %v2894_v42 }
 0x380   : > { %v3123_v18 = vpop.f32.mrf.mxu1  ;;  %3426 = vmatpush.xpose.msra.mxu0 %v5422_v21  ;;  %v3391_v44 = vand.u32 4294901760, %v5422_v21 }
 0x381   : > { %v3124_v28 = vadd.f32 %v3123_v18, %v3073_v8  ;;  %v3076_v5 = vpop.f32.mrf.mxu0  ;;  %v3018_v51 = vadd.f32 %v3017_v24, %v2953_v26  ;;  %v5771_v8 = vld [vmem:[#allocation34_spill] sm:$0xff]  ;;  %v5772_v18 = vld [vmem:[#allocation44_spill] sm:$0xff] }
 0x382   : > { %3297 = vmatpush.xpose.msrb.mxu2 %v3201_v1  ;;  %3262 = vmatpush.xpose.msra.mxu3 %v5403_v10  ;;  %v3392_v33 = vsub.f32 %v5422_v21, %v3391_v44  ;;  %v5768_v1 = vld [vmem:[#allocation33_spill] sm:$0xff] }
 0x383   : > { %3458 = vmatpush.xpose.msra.mxu1 %v5419_v45  ;;  %v3531_v27 = vsel %vm348_vm0, %v3124_v28, 0  ;;  %v3077_v2 = vadd.f32 %v3076_v5, %v3018_v51  ;;  %v5774_v28 = vld [vmem:[#allocation38_spill] sm:$0xff]  ;;  %v5776_v5 = vld [vmem:[#allocation25_spill] sm:$0xff]  ;;  %v5778_v51 = vld [vmem:[#allocation43_spill] sm:$0xff] }
 0x384   : > { %3429 = vmatpush.xpose.msra.mxu0 %v5430_v55  ;;  %v5442_v7 = vand.u32 4294901760, %v3531_v27  ;;  %v3393_v59 = vand.u32 4294901760, %v3392_v33  ;;  %v5784_v33 = vld [vmem:[#allocation39_spill] sm:$0xff] }
 0x385   : > { %3210 = vmatmul.f32.gmra.mxu3 %v5761_v37  ;;  %3236 = vmatmul.f32.vlgmr.msra.gmra.mxu2 %v5762_v23  ;;  %v3023_v58 = vpop.f32.mrf.mxu3  ;;  %v2962_v19 = vpop.f32.mrf.mxu2  ;;  %v5779_v23 = vld [vmem:[#allocation45_spill] sm:$0xff] }
 0x386   : > { %3322 = vmatpush.xpose.msrb.mxu3 %v3158_v39  ;;  %3355 = vmatpush.xpose.msra.mxu2 %v5415_v61  ;;  %v5449_v9 = vsub.f32 %v3531_v27, %v5442_v7  ;;  %v2963_v16 = vadd.f32 %v2962_v19, %v2902_v47  ;;  %v3024_v32 = vadd.f32 %v3023_v58, %v2958_v13 }
 0x387   : > { %3462 = vmatmul.f32.vlgmr.msra.gmra.mxu1 %v5763_v46  ;;  %3432 = vmatmul.f32.vlgmr.msra.gmra.mxu0 %v5764_v12  ;;  %v5780_v46 = vld [vmem:[#allocation47_spill] sm:$0xff]  ;;  %v5782_v12 = vld [vmem:[#allocation49_spill] sm:$0xff] }
 0x388   : > { %v3127_v20 = vpop.f32.mrf.mxu1  ;;  %v3593_v60 = vand.u32 4294901760, %v5449_v9 }
 0x389   : > { %v3128_v4 = vadd.f32 %v3127_v20, %v3077_v2  ;;  %v3080_v38 = vpop.f32.mrf.mxu0  ;;  %v5781_v2 = vld [vmem:[#allocation35_spill] sm:$0xff]  ;;  %v5783_v20 = vld [vmem:[#allocation37_spill] sm:$0xff] }
 0x38a   : > { %3324 = vmatpush.xpose.msrb.mxu3 %v5403_v10  ;;  %v3397_v10 = vand.u32 4294901760, %v5430_v55  ;;  %3357 = vmatpush.xpose.msra.mxu2 %v5419_v45  ;;  %v3594_v40 = vsub.f32 %v5449_v9, %v3593_v60  ;;  %v3081_v17 = vadd.f32 %v3080_v38, %v3024_v32 }
 0x38b   : > { %v3534_v22 = vsel %vm348_vm0, %v3128_v4, 0 }
 0x38c   : > { %v5451_v62 = vand.u32 4294901760, %v3534_v22  ;;  %v3398_v39 = vsub.f32 %v5430_v55, %v3397_v10  ;;  %v3595_v25 = vand.u32 4294901760, %v3594_v40  ;;  %v5777_v55 = vld [vmem:[#allocation30_spill] sm:$0xff] }
 0x38d   : > { %3241 = vmatmul.f32.gmra.mxu2 %v5765_v43  ;;  %3266 = vmatmul.f32.vlgmr.msra.gmra.mxu3 %v5766_v48  ;;  %v3029_v53 = vpop.f32.mrf.mxu3  ;;  %v5788_v43 = vld [vmem:[#allocation50_spill] sm:$0xff] }
 0x38e   : > { %v3586_v29 = vsub.f32 %v3534_v22, %v5451_v62  ;;  %3394 = vmatpush.xpose.msra.mxu3 %v3393_v59  ;;  %3551 = vmatpush.xpose.msrb.mxu0 %v5451_v62  ;;  %v3399_v54 = vand.u32 4294901760, %v3398_v39  ;;  %v3030_v34 = vadd.f32 %v3029_v53, %v2963_v16  ;;  %v5787_v39 = vld [vmem:[#allocation42_spill] sm:$0xff] }
 0x38f   : > { %3437 = vmatmul.f32.gmra.mxu0 %v5767_v11  ;;  %3468 = vmatmul.f32.gmra.mxu1 %v5768_v1  ;;  %v5789_v48 = vld [vmem:[#allocation46_spill] sm:$0xff] }
 0x390   : > { %v3131_v35 = vpop.f32.mrf.mxu1  ;;  %v3587_v15 = vand.u32 4294901760, %v3586_v29 }
 0x391   : > { %v3084_v50 = vpop.f32.mrf.mxu0  ;;  %v3132_v36 = vadd.f32 %v3131_v35, %v3081_v17 }
 0x392   : > { %3400 = vmatpush.xpose.msra.mxu3 %v3399_v54  ;;  %3553 = vmatpush.xpose.msrb.mxu0 %v5442_v7  ;;  %v3588_v49 = vsub.f32 %v3586_v29, %v3587_v15  ;;  %v3085_v6 = vadd.f32 %v3084_v50, %v3030_v34 }
 0x393   : > { %v3727_v57 = vsel %vm348_vm0, %v3132_v36, 0 }
 0x394   : > { %v3589_v63 = vand.u32 4294901760, %v3588_v49  ;;  %v3748_v21 = vand.u32 4294901760, %v3727_v57 }
 0x395   : > { %3272 = vmatmul.f32.gmra.mxu3 %v5769_v14  ;;  %3299 = vmatmul.f32.vlgmr.msrb.gmra.mxu2 %v5760_v56 }
 0x396   : > { %3685 = vmatpush.xpose.msra.mxu0 %v3587_v15  ;;  %3489 = vmatpush.xpose.msrb.mxu2 %v3391_v44  ;;  %v3788_v42 = vsub.f32 %v3727_v57, %v3748_v21 }
 0x397   : > { %3590 = vmatpush.xpose.msrb.mxu1 %v3589_v63  ;;  %3559 = vmatmul.f32.vlgmr.msrb.gmra.mxu0 %v5770_v31 }
 0x398   : > { %v3135_v0 = vpop.f32.mrf.mxu1  ;;  %v3789_v44 = vand.u32 4294901760, %v3788_v42 }
 0x399   : > { %v3136_v52 = vadd.f32 %v3135_v0, %v3085_v6 }
 0x39a   : > { %3689 = vmatpush.xpose.msra.mxu0 %v3593_v60  ;;  %3493 = vmatpush.xpose.msrb.mxu2 %v3397_v10 }
 0x39b   : > { %3596 = vmatpush.xpose.msrb.mxu1 %v3595_v25  ;;  %v3730_v41 = vsel %vm348_vm0, %v3136_v52, 0 }
 0x39c   : > { %v3746_v3 = vand.u32 4294901760, %v3730_v41 }
 0x39d   : > { %3303 = vmatmul.f32.gmra.mxu2 %v5761_v37  ;;  %3326 = vmatmul.f32.vlgmr.msrb.gmra.mxu3 %v5760_v56  ;;  %v5773_v56 = vld [vmem:[#allocation32_spill] sm:$0xff] }
 0x39e   : > { %v3782_v24 = vsub.f32 %v3730_v41, %v3746_v3  ;;  %3518 = vmatpush.xpose.msrb.mxu3 %v5415_v61  ;;  %3598 = vmatmul.f32.vlgmr.msrb.gmra.mxu1 %v5771_v8  ;;  %v5775_v61 = vld [vmem:[#allocation36_spill] sm:$0xff] }
 0x39f   : > { %3714 = vmatpush.xpose.msra.mxu1 %v5451_v62  ;;  %3567 = vmatmul.f32.gmra.mxu0 %v5772_v18 }
 0x3a0   : > { %3818 = vmatpush.xpose.msrb.mxu0 %v3782_v24 }
 0x3a2   : > { %3520 = vmatpush.xpose.msrb.mxu3 %v5419_v45  ;;  %v3783_v45 = vand.u32 4294901760, %v3782_v24 }
 0x3a3   : > { %3716 = vmatpush.xpose.msra.mxu1 %v5442_v7 }
 0x3a4   : > { %3821 = vmatpush.xpose.msrb.mxu0 %v3788_v42  ;;  %v3784_v26 = vsub.f32 %v3782_v24, %v3783_v45 }
 0x3a5   : > { %3330 = vmatmul.f32.gmra.mxu3 %v5761_v37  ;;  %3363 = vmatmul.f32.vlgmr.msra.gmra.mxu2 %v5773_v56  ;;  %v3790_v37 = vsub.f32 %v3788_v42, %v3789_v44 }
 0x3a6   : > { %3622 = vmatpush.xpose.msra.mxu2 %v3586_v29  ;;  %3602 = vmatmul.f32.gmra.mxu1 %v5774_v28  ;;  %v3785_v27 = vand.u32 4294901760, %v3784_v26 }
 0x3a7   : > { %3848 = vmatpush.xpose.msrb.mxu1 %v3746_v3  ;;  %3691 = vmatmul.f32.vlgmr.msra.gmra.mxu0 %v5771_v8  ;;  %v3791_v30 = vand.u32 4294901760, %v3790_v37 }
 0x3aa   : > { %3625 = vmatpush.xpose.msra.mxu2 %v5449_v9  ;;  %v5785_v9 = vld [vmem:[#allocation41_spill] sm:$0xff] }
 0x3ab   : > { %3850 = vmatpush.xpose.msrb.mxu1 %v3748_v21 }
 0x3ad   : > { %3371 = vmatmul.f32.gmra.mxu2 %v5775_v61  ;;  %3402 = vmatmul.f32.vlgmr.msra.gmra.mxu3 %v5776_v5 }
 0x3ae   : > { %3652 = vmatpush.xpose.msra.mxu3 %v5451_v62  ;;  %3718 = vmatmul.f32.vlgmr.msra.gmra.mxu1 %v5771_v8  ;;  %v5786_v62 = vld [vmem:[#allocation48_spill] sm:$0xff] }
 0x3af   : > { %3695 = vmatmul.f32.gmra.mxu0 %v5774_v28 }
 0x3b2   : > { %3654 = vmatpush.xpose.msra.mxu3 %v5442_v7 }
 0x3b5   : > { %3406 = vmatmul.f32.gmra.mxu3 %v5777_v55  ;;  %3495 = vmatmul.f32.vlgmr.msrb.gmra.mxu2 %v5776_v5 }
 0x3b6   : > { %3747 = vmatpush.xpose.msrb.mxu2 %v3746_v3  ;;  %3722 = vmatmul.f32.gmra.mxu1 %v5774_v28 }
 0x3b7   : > { %3824 = vmatmul.f32.vlgmr.msrb.gmra.mxu0 %v5778_v51 }
 0x3ba   : > { %3749 = vmatpush.xpose.msrb.mxu2 %v3748_v21 }
 0x3bd   : > { %3499 = vmatmul.f32.gmra.mxu2 %v5777_v55  ;;  %3522 = vmatmul.f32.vlgmr.msrb.gmra.mxu3 %v5776_v5 }
 0x3be   : > { %3786 = vmatpush.xpose.msrb.mxu3 %v3785_v27  ;;  %3854 = vmatmul.f32.vlgmr.msrb.gmra.mxu1 %v5779_v23 }
 0x3bf   : > { %3829 = vmatmul.f32.gmra.mxu0 %v5780_v46 }
 0x3c2   : > { %3792 = vmatpush.xpose.msrb.mxu3 %v3791_v30 }
 0x3c5   : > { %3526 = vmatmul.f32.gmra.mxu3 %v5777_v55  ;;  %3628 = vmatmul.f32.vlgmr.msra.gmra.mxu2 %v5781_v2 }
 0x3c6   : > { %3881 = vmatpush.xpose.msra.mxu2 %v3783_v45  ;;  %3860 = vmatmul.f32.gmra.mxu1 %v5782_v12 }
 0x3ca   : > { %3885 = vmatpush.xpose.msra.mxu2 %v3789_v44 }
 0x3cb   : > { %v2750_v7 = vpop.xlane.xlu0 %2749 }
 0x3cc   : > { %v2751_v58 = vrot.slane %v2750_v7, 4 }
 0x3cd   : > { %3658 = vmatmul.f32.vlgmr.msra.gmra.mxu3 %v5783_v20  ;;  %3633 = vmatmul.f32.gmra.mxu2 %v5784_v33 }
 0x3ce   : > { %v2752_v10 = vadd.f32 %v2751_v58, %v2750_v7  ;;  %3910 = vmatpush.xpose.msra.mxu3 %v3746_v3 }
 0x3d0   : > { %v2753_v4 = vrot.slane %v2752_v10, 2 }
 0x3d2   : > { %v2754_v38 = vadd.f32 %v2753_v4, %v2752_v10  ;;  %3912 = vmatpush.xpose.msra.mxu3 %v3748_v21 }
 0x3d4   : > { %v2755_v22 = vrot.slane %v2754_v38, 1 }
 0x3d5   : > { %3664 = vmatmul.f32.gmra.mxu3 %v5785_v9  ;;  %3755 = vmatmul.f32.vlgmr.msrb.gmra.mxu2 %v5786_v62 }
 0x3d6   : > { %v2756_v59 = vadd.f32 %v2755_v22, %v2754_v38 }
 0x3d8   : > { %4126 = vpush %v2756_v59 }
 0x3dd   : > { %3794 = vmatmul.f32.vlgmr.msrb.gmra.mxu3 %v5787_v39  ;;  %3763 = vmatmul.f32.gmra.mxu2 %v5788_v43 }
 0x3e5   : > { %3798 = vmatmul.f32.gmra.mxu3 %v5789_v48  ;;  %3887 = vmatmul.f32.vlgmr.msra.gmra.mxu2 %v5787_v39 }
 0x3ed   : > { %3914 = vmatmul.f32.vlgmr.msra.gmra.mxu3 %v5787_v39  ;;  %3891 = vmatmul.f32.gmra.mxu2 %v5789_v48 }
 0x3f5   : > { %3918 = vmatmul.f32.gmra.mxu3 %v5789_v48 }
 0x3f8   : > { %v3168_v29 = vpop.f32.mrf.mxu2 }
 0x400   : > { %v3207_v11 = vpop.f32.mrf.mxu3  ;;  %v3176_v1 = vpop.f32.mrf.mxu2 }
 0x401   : > { %v3208_v19 = vadd.f32 %v3207_v11, %v3168_v29 }
 0x404   : > { %v3433_v36 = vpop.f32.mrf.mxu0  ;;  %v3463_v31 = vpop.f32.mrf.mxu1 }
 0x408   : > { %v3211_v35 = vpop.f32.mrf.mxu3  ;;  %v3237_v54 = vpop.f32.mrf.mxu2 }
 0x409   : > { %v3212_v15 = vadd.f32 %v3211_v35, %v3176_v1  ;;  %v3238_v60 = vadd.f32 %v3237_v54, %v3208_v19  ;;  %s4127_s26 = spop %4126 }
 0x40a   : > { %s2758_s10 = sadd.f32 %s4127_s26, %s4125_s23 }
 0x40c   : > { %v3438_v41 = vpop.f32.mrf.mxu0  ;;  %v3469_v3 = vpop.f32.mrf.mxu1 }
 0x410   : > { %v3267_v47 = vpop.f32.mrf.mxu3  ;;  %v3242_v13 = vpop.f32.mrf.mxu2 }
 0x411   : > { %v3268_v53 = vadd.f32 %v3267_v47, %v3238_v60  ;;  %v3243_v49 = vadd.f32 %v3242_v13, %v3212_v15 }
 0x414   : > { %v3560_v8 = vpop.f32.mrf.mxu0 }
 0x418   : > { %v3273_v16 = vpop.f32.mrf.mxu3  ;;  %v3300_v32 = vpop.f32.mrf.mxu2 }
 0x419   : > { %v3274_v50 = vadd.f32 %v3273_v16, %v3243_v49  ;;  %v3301_v63 = vadd.f32 %v3300_v32, %v3268_v53 }
 0x41b   : > { %v3599_v18 = vpop.f32.mrf.mxu1 }
 0x41c   : > { %v3568_v28 = vpop.f32.mrf.mxu0  ;;  %v3600_v7 = vadd.f32 %v3599_v18, %v3560_v8 }
 0x420   : > { %v3327_v40 = vpop.f32.mrf.mxu3  ;;  %v3304_v17 = vpop.f32.mrf.mxu2 }
 0x421   : > { %v5512_v34 = vadd.f32 %v3327_v40, %v3301_v63  ;;  %v3305_v14 = vadd.f32 %v3304_v17, %v3274_v50 }
 0x423   : > { %v3603_v45 = vpop.f32.mrf.mxu1 }
 0x424   : > { %v3692_v55 = vpop.f32.mrf.mxu0  ;;  %v3604_v58 = vadd.f32 %v3603_v45, %v3568_v28 }
 0x428   : > { %v3331_v6 = vpop.f32.mrf.mxu3  ;;  %v3364_v0 = vpop.f32.mrf.mxu2 }
 0x429   : > { %v5514_v25 = vadd.f32 %v3331_v6, %v3305_v14 }
 0x42b   : > { %v3719_v51 = vpop.f32.mrf.mxu1 }
 0x42c   : > { %v3696_v23 = vpop.f32.mrf.mxu0 }
 0x430   : > { %v3403_v52 = vpop.f32.mrf.mxu3  ;;  %v3372_v57 = vpop.f32.mrf.mxu2 }
 0x431   : > { %v3404_v12 = vadd.f32 %v3403_v52, %v3364_v0 }
 0x433   : > { %v3723_v30 = vpop.f32.mrf.mxu1  ;;  %v3434_v33 = vadd.f32 %v3433_v36, %v3404_v12  ;;  %v3922_v36 = vsel %vm348_vm0, %v5512_v34, 0.0 }
 0x434   : > { %v3825_v20 = vpop.f32.mrf.mxu0 }
 0x435   : > { %v3464_v59 = vadd.f32 %v3463_v31, %v3434_v33 }
 0x438   : > { %v3407_v21 = vpop.f32.mrf.mxu3  ;;  %v3496_v24 = vpop.f32.mrf.mxu2 }
 0x439   : > { %v3408_v10 = vadd.f32 %v3407_v21, %v3372_v57  ;;  %v3497_v11 = vadd.f32 %v3496_v24, %v3464_v59  ;;  %v3929_v24 = vsel %vm348_vm0, %v5514_v25, 0.0 }
 0x43b   : > { %v3855_v62 = vpop.f32.mrf.mxu1  ;;  %v3439_v39 = vadd.f32 %v3438_v41, %v3408_v10 }
 0x43c   : > { %v3830_v47 = vpop.f32.mrf.mxu0 }
 0x43d   : > { %v3470_v35 = vadd.f32 %v3469_v3, %v3439_v39 }
 0x440   : > { %v3523_v42 = vpop.f32.mrf.mxu3  ;;  %v3500_v56 = vpop.f32.mrf.mxu2 }
 0x441   : > { %v3524_v54 = vadd.f32 %v3523_v42, %v3497_v11  ;;  %v3501_v13 = vadd.f32 %v3500_v56, %v3470_v35 }
 0x443   : > { %v3923_v50 = vsel %vm348_vm0, %v3524_v54, 0.0  ;;  %v3861_v14 = vpop.f32.mrf.mxu1 }
 0x444   : > { %v3924_v31 = vadd.f32 %v3923_v50, %v3922_v36 }
 0x448   : > { %v3527_v61 = vpop.f32.mrf.mxu3  ;;  %v3629_v5 = vpop.f32.mrf.mxu2 }
 0x449   : > { %v3630_v4 = vadd.f32 %v3629_v5, %v3600_v7  ;;  %v3528_v63 = vadd.f32 %v3527_v61, %v3501_v13  ;;  %v3937_v61 = vld [vmem:[#allocation7 + $0x20] sm:$0xff] }
 0x44b   : > { %v3930_v57 = vsel %vm348_vm0, %v3528_v63, 0.0 }
 0x44c   : > { %v3931_v42 = vadd.f32 %v3930_v57, %v3929_v24 }
 0x450   : > { %v3659_v26 = vpop.f32.mrf.mxu3  ;;  %v3634_v44 = vpop.f32.mrf.mxu2 }
 0x451   : > { %v3660_v22 = vadd.f32 %v3659_v26, %v3630_v4  ;;  %v3635_v43 = vadd.f32 %v3634_v44, %v3604_v58 }
 0x453   : > { %v3693_v1 = vadd.f32 %v3692_v55, %v3660_v22  ;;  %v3938_v55 = vld [vmem:[#allocation7 + $0x28] sm:$0xff] }
 0x455   : > { %v3720_v53 = vadd.f32 %v3719_v51, %v3693_v1 }
 0x457   : > { %v3925_v6 = vsel %vm348_vm0, %v3720_v53, 0.0 }
 0x458   : > { %v3665_v27 = vpop.f32.mrf.mxu3  ;;  %v3756_v37 = vpop.f32.mrf.mxu2  ;;  %v3926_v21 = vadd.f32 %v3925_v6, %v3924_v31 }
 0x459   : > { %v3666_v19 = vadd.f32 %v3665_v27, %v3635_v43 }
 0x45b   : > { %v3697_v49 = vadd.f32 %v3696_v23, %v3666_v19 }
 0x45d   : > { %v3724_v0 = vadd.f32 %v3723_v30, %v3697_v49 }
 0x45f   : > { %v3932_v8 = vsel %vm348_vm0, %v3724_v0, 0.0 }
 0x460   : > { %v3795_v46 = vpop.f32.mrf.mxu3  ;;  %v3764_v2 = vpop.f32.mrf.mxu2  ;;  %v3933_v5 = vadd.f32 %v3932_v8, %v3931_v42 }
 0x461   : > { %v3796_v38 = vadd.f32 %v3795_v46, %v3756_v37 }
 0x463   : > { %v3826_v48 = vadd.f32 %v3825_v20, %v3796_v38 }
 0x465   : > { %v3856_v60 = vadd.f32 %v3855_v62, %v3826_v48 }
 0x468   : > { %v3799_v9 = vpop.f32.mrf.mxu3  ;;  %v3888_v29 = vpop.f32.mrf.mxu2 }
 0x469   : > { %v3800_v15 = vadd.f32 %v3799_v9, %v3764_v2  ;;  %v3889_v16 = vadd.f32 %v3888_v29, %v3856_v60 }
 0x46b   : > { %v3831_v17 = vadd.f32 %v3830_v47, %v3800_v15 }
 0x46d   : > { %v3862_v3 = vadd.f32 %v3861_v14, %v3831_v17 }
 0x470   : > { %v3915_v32 = vpop.f32.mrf.mxu3  ;;  %v3892_v52 = vpop.f32.mrf.mxu2 }
 0x471   : > { %v3916_v40 = vadd.f32 %v3915_v32, %v3889_v16  ;;  %v3893_v18 = vadd.f32 %v3892_v52, %v3862_v3 }
 0x473   : > { %v3927_v41 = vsel %vm348_vm0, %v3916_v40, 0.0 }
 0x474   : > { %v3928_v56 = vadd.f32 %v3927_v41, %v3926_v21 }
 0x476   : > { %v3939_v44 = vmul.f32 %v3937_v61, %v3928_v56 }
 0x478   : > { %v3919_v34 = vpop.f32.mrf.mxu3  ;;  %v3941_v27 = vsel %vm348_vm0, %v3939_v44, 0.0 }
 0x479   : > { %v3920_v28 = vadd.f32 %v3919_v34, %v3893_v18 }
 0x47b   : > { %v3934_v45 = vsel %vm348_vm0, %v3920_v28, 0.0 }
 0x47c   : > { %v3935_v26 = vadd.f32 %v3934_v45, %v3933_v5 }
 0x47e   : > { %v3940_v51 = vmul.f32 %v3938_v55, %v3935_v26 }
 0x480   : > { %v3942_v25 = vsel %vm348_vm0, %v3940_v51, 0.0 }
 0x481   : > { %v3943_v37 = vadd.f32 %v3942_v25, %v3941_v27 }
 0x483   : > { %3944 = vadd.xlane.f32.xlu1 %v3943_v37 }
 0x4f6   : > { %v3945_v23 = vpop.xlane.xlu1 %3944 }
 0x4f7   : > { %v3946_v30 = vrot.slane %v3945_v23, 4 }
 0x4f9   : > { %v3947_v46 = vadd.f32 %v3946_v30, %v3945_v23 }
 0x4fb   : > { %v3948_v2 = vrot.slane %v3947_v46, 2 }
 0x4fd   : > { %v3949_v12 = vadd.f32 %v3948_v2, %v3947_v46 }
 0x4ff   : > { %v3950_v7 = vrot.slane %v3949_v12, 1 }
 0x501   : > { %v3951_v58 = vadd.f32 %v3950_v7, %v3949_v12 }
 0x503   : > { %4128 = vpush %v3951_v58 }
 0x534   : > { %s4129_s11 = spop %4128 }
 0x535   : > { %s3953_s5 = sadd.f32 %s4129_s11, %s2758_s10 }
 0x537   : > { %v3955_v20 = vstv %s3953_s5 }
 0x538   : > { %3957 = vst [vmem:[%s312_s25] sm:$0xff] %v3955_v20 }
 0x539   : > { %4368 = shalt.err (!%p4365_p0)
}
 0x53a   : > { %4142 = dma.vmem_to_hbm [thread:$0]  (%p4551_p7), %s3972_s13, 128, %s3974_s6, %s3959_s7  }
 0x53b PF: > { %s3985_s2 = sand.u32 1, %s4415_s15   ;;  %p4159_p3 = pnand %p4101_p11, %p4511_p6 }
 0x53c   : > { %s3986_s21 = scalar_lea.sflag [#allocation4], %s3985_s2 }
 0x53d   : > { %p4160_p5 = pneg %p4159_p3 }
 0x53f   : > { %4410 = dma.done.wait (%p4160_p5), %s3986_s21, 128  }
 0x540   : > { %4412 = vsyncadd (%p4160_p5), %s3986_s21, 4294967168  ;;  %s24_s20 = sadd.s32 1, %s4435_s20   ;;  %s5790_s23 = sld [smem:[#allocation18_spill]] }
 0x541   : > { %p21_p9 = scmp.ge.s32.totalorder %s24_s20, 4   ;;  %s5791_s18 = sld [smem:[#allocation16_spill]] }
 0x542   : > { %s5792_s19 = sld [smem:[#allocation17_spill]]  ;;  %s5793_s15 = smov %s4419_s16 }
 0x543   : > { %s5794_s16 = smov %s4423_s17  ;;  %23 = sbr.rel (!%p21_p9) target bundleno = 12 (0xc), region = 110 }
 0x546   : > { %s5795_s17 = smov %s5790_s23 }
 0x548   :  { %3992 = vsyncpa [#allocation3], 1 }
 0x549   :  { %3994 = vsyncpa [#allocation3 + $0x1], 1 }
 0x54a   :  { %3995 = vsyncpa [#allocation6], 1 }
 0x54b   :  { %3997 = vsyncpa [#allocation6 + $0x1], 1 }
 0x54c   :  { %3998 = vsyncpa [#allocation9], 1 }
 0x54d   :  { %3999 = vsyncpa [#allocation4], 1 }
 0x54e   :  { %4001 = vsyncpa [#allocation4 + $0x1], 1 }

</bundles_post_ra>
